<compile_context>
chip_gen: v5e
topology: v5e:2x2
jax: 0.10.0
libtpu: 0.0.40
codegen_flags: <defaults>
</compile_context>

<pallas_src>
import functools

import jax
import jax.numpy as jnp
from jax import lax
from jax.experimental import pallas as pl
from jax.experimental.pallas import tpu as pltpu

# ---------------- scaled-down problem constants ----------------
TRUE_BATCH = 4       # real batch_size
BATCH_PAD = 8        # padded to the f32 sublane tile (8)
VOCAB = 128          # vocabulary_size == input_size == output_size
HIDDEN = 32          # hidden_size
START = 4            # `start` in Model.forward (was 50)
SEQ_LEN = 8          # `seq_len` in Model.forward (was 150)
T_DEC = SEQ_LEN + 1 - START
EOS_TOKEN = VOCAB - 1
SOS_TOKEN = VOCAB - 2


# ---------------------------- kernel ----------------------------
def seq2seq_loss_kernel(enc_ih_ref, dec_ih_ref, dec_tgt_ref,
                        enc_whh_ref, dec_whh_ref,
                        out_w_ref, out_b_ref,
                        loss_ref,
                        *, hidden_size, true_batch, n_enc, n_dec):
    H = hidden_size
    B = enc_ih_ref.shape[1]
    V = out_w_ref.shape[1]

    # -------- hoisted loads / broadcasts (outside the recurrent loops) ------
    enc_whh = enc_whh_ref[...]                               # (H, 4H)
    dec_whh = dec_whh_ref[...]                               # (H, 4H)
    out_w = out_w_ref[...]                                   # (H, V)
    out_b = jnp.broadcast_to(out_b_ref[...], (B, V))         # (B, V)
    lane_iota = lax.broadcasted_iota(jnp.int32, (B, V), 1)   # (B, V)

    def gates_to_state(gates, c):
        # full-width activations (2 EUP passes on the whole (B,4H) vreg),
        # then static lane slices.  PyTorch gate order: i, f, g, o.
        s = jax.nn.sigmoid(gates)
        t = jnp.tanh(gates)
        i_g = s[:, 0 * H:1 * H]
        f_g = s[:, 1 * H:2 * H]
        g_g = t[:, 2 * H:3 * H]
        o_g = s[:, 3 * H:4 * H]
        c_new = f_g * c + i_g * g_g
        h_new = o_g * jnp.tanh(c_new)
        return h_new, c_new

    zeros_state = jnp.zeros((B, H), jnp.float32)

    # ---- encoder: hidden starts at zeros, consume reversed prefix ----
    # ih (incl. bias) precomputed in the wrapper -> only whh matmul here.
    def enc_body(t, carry):
        h, c = carry
        gates = enc_ih_ref[t] + jnp.dot(h, enc_whh,
                                        preferred_element_type=jnp.float32)
        return gates_to_state(gates, c)

    h, _ = lax.fori_loop(0, n_enc, enc_body,
                         (zeros_state, zeros_state), unroll=True)

    # ---- decoder: hidden = (encoder h, zero cell), teacher forcing ----
    def dec_body(t, carry):
        h, c, loss_acc = carry
        gates = dec_ih_ref[t] + jnp.dot(h, dec_whh,
                                        preferred_element_type=jnp.float32)
        h, c = gates_to_state(gates, c)
        logits = jnp.dot(h, out_w,
                         preferred_element_type=jnp.float32) + out_b  # (B, V)
        # cross entropy = logsumexp(logits) - logits[target]
        m = jnp.max(logits, axis=-1, keepdims=True)
        lse = m + jnp.log(jnp.sum(jnp.exp(logits - m), axis=-1, keepdims=True))
        tgt = dec_tgt_ref[t]                                  # (B, 1) int32
        tgt_logit = jnp.sum(jnp.where(lane_iota == tgt, logits, 0.0),
                            axis=-1, keepdims=True)
        return h, c, loss_acc + (lse - tgt_logit)

    _, _, per_example = lax.fori_loop(
        0, n_dec, dec_body,
        (h, zeros_state, jnp.zeros((B, 1), jnp.float32)),
        unroll=True)

    # mask out padded batch rows; torch.sum(loss) / batch_size
    valid = (lax.broadcasted_iota(jnp.int32, (B, 1), 0)
             < true_batch).astype(jnp.float32)
    loss_ref[0, 0] = jnp.sum(per_example * valid) / true_batch


# ---------------------------- wrapper ----------------------------
def model_forward(token_seqs, params):
    """token_seqs: int32 (TRUE_BATCH, SEQ_LEN). Returns scalar loss."""
    tb = token_seqs.shape[0]

    # pad batch with dummy rows (token 0) up to the f32 sublane tile of 8
    pad_rows = BATCH_PAD - tb
    tok = jnp.concatenate(
        [token_seqs, jnp.zeros((pad_rows, SEQ_LEN), token_seqs.dtype)], axis=0)

    # --- precompute the input->hidden projections outside the recurrence ---
    # x is one-hot, so x @ W_ih == W_ih[token]; F.relu(one-hot) is a no-op.
    enc_tok = tok[:, START - 1::-1]                           # (B, START) reversed
    enc_ih = (params["enc_wih"][enc_tok]                      # (B, START, 4H)
              + params["enc_b"]).transpose(1, 0, 2)           # (START, B, 4H)

    dec_in_tok = tok[:, START - 1:SEQ_LEN]                    # (B, T_DEC)
    dec_ih = (params["dec_wih"][dec_in_tok]
              + params["dec_b"]).transpose(1, 0, 2)           # (T_DEC, B, 4H)

    eos = jnp.full((BATCH_PAD, 1), EOS_TOKEN, tok.dtype)
    dec_tgt = jnp.concatenate([tok[:, START:SEQ_LEN], eos], axis=1)  # (B, T_DEC)
    dec_tgt = dec_tgt.T[:, :, None].astype(jnp.int32)         # (T_DEC, B, 1)

    kernel = functools.partial(seq2seq_loss_kernel,
                               hidden_size=HIDDEN, true_batch=tb,
                               n_enc=START, n_dec=T_DEC)

    loss = pl.pallas_call(
        kernel,
        out_shape=jax.ShapeDtypeStruct((1, 1), jnp.float32),
        in_specs=[pl.BlockSpec(memory_space=pltpu.MemorySpace.VMEM)] * 7,
        out_specs=pl.BlockSpec(memory_space=pltpu.MemorySpace.SMEM),
    )(enc_ih, dec_ih, dec_tgt,
      params["enc_whh"], params["dec_whh"],
      params["out_w"], params["out_b"])
    return loss[0, 0]


# ------------------------- param init (deterministic) -------------------------
def init_params(key):
    k = 1.0 / jnp.sqrt(HIDDEN)
    keys = jax.random.split(key, 10)

    def u(kk, shape):
        return jax.random.uniform(kk, shape, jnp.float32, -k, k)

    # weights stored pre-transposed for x @ W   (gate order: i, f, g, o)
    return dict(
        enc_wih=u(keys[0], (VOCAB, 4 * HIDDEN)),
        enc_whh=u(keys[1], (HIDDEN, 4 * HIDDEN)),
        enc_b=u(keys[2], (1, 4 * HIDDEN)) + u(keys[3], (1, 4 * HIDDEN)),  # b_ih + b_hh
        dec_wih=u(keys[4], (VOCAB, 4 * HIDDEN)),
        dec_whh=u(keys[5], (HIDDEN, 4 * HIDDEN)),
        dec_b=u(keys[6], (1, 4 * HIDDEN)) + u(keys[7], (1, 4 * HIDDEN)),
        out_w=u(keys[8], (HIDDEN, VOCAB)),
        out_b=u(keys[9], (1, VOCAB)),
    )


# ---------------------- pure-JAX reference (for checking) ----------------------
def reference_forward(token_seqs, params):
    B = token_seqs.shape[0]
    H = HIDDEN
    eye = jnp.eye(VOCAB, dtype=jnp.float32)

    def lstm_step(x, h, c, wih, whh, b):
        g = x @ wih + h @ whh + b
        i_g = jax.nn.sigmoid(g[:, 0 * H:1 * H])
        f_g = jax.nn.sigmoid(g[:, 1 * H:2 * H])
        g_g = jnp.tanh(g[:, 2 * H:3 * H])
        o_g = jax.nn.sigmoid(g[:, 3 * H:4 * H])
        c = f_g * c + i_g * g_g
        return o_g * jnp.tanh(c), c

    h = jnp.zeros((B, H), jnp.float32)
    c = jnp.zeros((B, H), jnp.float32)
    for i in range(START - 1, -1, -1):
        x = eye[token_seqs[:, i]]
        h, c = lstm_step(x, h, c, params["enc_wih"], params["enc_whh"],
                         params["enc_b"])
    c = jnp.zeros((B, H), jnp.float32)
    dec_in = eye[token_seqs[:, START - 1]]
    loss = jnp.zeros((B,), jnp.float32)
    for i in range(START, SEQ_LEN + 1):
        x = jnp.maximum(dec_in, 0.0)
        h, c = lstm_step(x, h, c, params["dec_wih"], params["dec_whh"],
                         params["dec_b"])
        logits = h @ params["out_w"] + params["out_b"]
        if i < SEQ_LEN:
            tgt = token_seqs[:, i]
        else:
            tgt = jnp.full((B,), EOS_TOKEN, token_seqs.dtype)
        lse = jax.nn.logsumexp(logits, axis=-1)
        loss = loss + (lse - logits[jnp.arange(B), tgt])
        dec_in = eye[tgt]
    return jnp.sum(loss) / B


# ------------------------------- main -------------------------------
if __name__ == "__main__":
    key = jax.random.PRNGKey(0)
    k_param, k_tok = jax.random.split(key)

    params = init_params(k_param)
    token_seqs = jax.random.randint(k_tok, (TRUE_BATCH, SEQ_LEN), 0, VOCAB - 2,
                                    dtype=jnp.int32)

    loss = jax.jit(model_forward)(token_seqs, params)
    loss = jax.block_until_ready(loss)

    ref = reference_forward(token_seqs, params)
    assert jnp.isfinite(loss), "kernel produced non-finite loss"
    assert jnp.allclose(loss, ref, rtol=2e-2, atol=2e-2), (loss, ref)

    print("KERNEL_OK")
</pallas_src>

<mosaic_0001>
module attributes {stable_mosaic.version = 11 : i64} {
  func.func @seq2seq_loss_kernel(%arg0: memref<4x8x128xf32, #tpu.memory_space<vmem>>, %arg1: memref<5x8x128xf32, #tpu.memory_space<vmem>>, %arg2: memref<5x8x1xi32, #tpu.memory_space<vmem>>, %arg3: memref<32x128xf32, #tpu.memory_space<vmem>>, %arg4: memref<32x128xf32, #tpu.memory_space<vmem>>, %arg5: memref<32x128xf32, #tpu.memory_space<vmem>>, %arg6: memref<1x128xf32, #tpu.memory_space<vmem>>, %arg7: memref<1x1xf32, #tpu.memory_space<smem>>) attributes {dimension_semantics = [], scalar_prefetch = 0 : i64, scratch_operands = 0 : i64, tpu.core_type = #tpu.core_type<tc>} {
    %c0 = arith.constant 0 : index
    %c0_0 = arith.constant 0 : index
    %0 = vector.load %arg3[%c0, %c0_0] : memref<32x128xf32, #tpu.memory_space<vmem>>, vector<32x128xf32>
    %c0_1 = arith.constant 0 : index
    %c0_2 = arith.constant 0 : index
    %1 = vector.load %arg4[%c0_1, %c0_2] : memref<32x128xf32, #tpu.memory_space<vmem>>, vector<32x128xf32>
    %c0_3 = arith.constant 0 : index
    %c0_4 = arith.constant 0 : index
    %2 = vector.load %arg5[%c0_3, %c0_4] : memref<32x128xf32, #tpu.memory_space<vmem>>, vector<32x128xf32>
    %c0_5 = arith.constant 0 : index
    %c0_6 = arith.constant 0 : index
    %3 = vector.load %arg6[%c0_5, %c0_6] : memref<1x128xf32, #tpu.memory_space<vmem>>, vector<1x128xf32>
    %4 = vector.shape_cast %3 : vector<1x128xf32> to vector<1x128xf32>
    %5 = vector.broadcast %4 : vector<1x128xf32> to vector<8x128xf32>
    %6 = tpu.iota {dimensions = array<i32: 1>} : vector<8x128xi32>
    %cst = arith.constant 0.000000e+00 : f32
    %7 = vector.broadcast %cst : f32 to vector<8x32xf32>
    %c0_i32 = arith.constant 0 : i32
    %8 = arith.index_cast %c0_i32 : i32 to index
    %c0_7 = arith.constant 0 : index
    %c0_8 = arith.constant 0 : index
    %9 = vector.load %arg0[%8, %c0_7, %c0_8] : memref<4x8x128xf32, #tpu.memory_space<vmem>>, vector<1x8x128xf32>
    %10 = vector.shape_cast %9 : vector<1x8x128xf32> to vector<8x128xf32>
    %cst_9 = arith.constant dense<0.000000e+00> : vector<8x128xf32>
    %11 = tpu.matmul %7, %0, %cst_9 {dimension_numbers = #tpu.dot_dimension_numbers<[1], [0], [0], [1], [0, 0, 1, 1], [], []>} : vector<8x32xf32>, vector<32x128xf32>, vector<8x128xf32> -> vector<8x128xf32>
    %12 = arith.addf %10, %11 : vector<8x128xf32>
    %13 = arith.negf %12 : vector<8x128xf32>
    %14 = math.exp %13 : vector<8x128xf32>
    %cst_10 = arith.constant 1.000000e+00 : f32
    %15 = vector.broadcast %cst_10 : f32 to vector<8x128xf32>
    %16 = arith.addf %15, %14 : vector<8x128xf32>
    %17 = arith.divf %15, %16 : vector<8x128xf32>
    %18 = math.tanh %12 : vector<8x128xf32>
    %19 = vector.extract_strided_slice %17 {offsets = [0, 0], sizes = [8, 32], strides = [1, 1]} : vector<8x128xf32> to vector<8x32xf32>
    %20 = vector.extract_strided_slice %17 {offsets = [0, 32], sizes = [8, 32], strides = [1, 1]} : vector<8x128xf32> to vector<8x32xf32>
    %21 = vector.extract_strided_slice %18 {offsets = [0, 64], sizes = [8, 32], strides = [1, 1]} : vector<8x128xf32> to vector<8x32xf32>
    %22 = vector.extract_strided_slice %17 {offsets = [0, 96], sizes = [8, 32], strides = [1, 1]} : vector<8x128xf32> to vector<8x32xf32>
    %23 = arith.mulf %20, %7 : vector<8x32xf32>
    %24 = arith.mulf %19, %21 : vector<8x32xf32>
    %25 = arith.addf %23, %24 : vector<8x32xf32>
    %26 = math.tanh %25 : vector<8x32xf32>
    %27 = arith.mulf %22, %26 : vector<8x32xf32>
    %c1_i32 = arith.constant 1 : i32
    %28 = arith.index_cast %c1_i32 : i32 to index
    %c0_11 = arith.constant 0 : index
    %c0_12 = arith.constant 0 : index
    %29 = vector.load %arg0[%28, %c0_11, %c0_12] : memref<4x8x128xf32, #tpu.memory_space<vmem>>, vector<1x8x128xf32>
    %30 = vector.shape_cast %29 : vector<1x8x128xf32> to vector<8x128xf32>
    %cst_13 = arith.constant dense<0.000000e+00> : vector<8x128xf32>
    %31 = tpu.matmul %27, %0, %cst_13 {dimension_numbers = #tpu.dot_dimension_numbers<[1], [0], [0], [1], [0, 0, 1, 1], [], []>} : vector<8x32xf32>, vector<32x128xf32>, vector<8x128xf32> -> vector<8x128xf32>
    %32 = arith.addf %30, %31 : vector<8x128xf32>
    %33 = arith.negf %32 : vector<8x128xf32>
    %34 = math.exp %33 : vector<8x128xf32>
    %cst_14 = arith.constant 1.000000e+00 : f32
    %35 = vector.broadcast %cst_14 : f32 to vector<8x128xf32>
    %36 = arith.addf %35, %34 : vector<8x128xf32>
    %37 = arith.divf %35, %36 : vector<8x128xf32>
    %38 = math.tanh %32 : vector<8x128xf32>
    %39 = vector.extract_strided_slice %37 {offsets = [0, 0], sizes = [8, 32], strides = [1, 1]} : vector<8x128xf32> to vector<8x32xf32>
    %40 = vector.extract_strided_slice %37 {offsets = [0, 32], sizes = [8, 32], strides = [1, 1]} : vector<8x128xf32> to vector<8x32xf32>
    %41 = vector.extract_strided_slice %38 {offsets = [0, 64], sizes = [8, 32], strides = [1, 1]} : vector<8x128xf32> to vector<8x32xf32>
    %42 = vector.extract_strided_slice %37 {offsets = [0, 96], sizes = [8, 32], strides = [1, 1]} : vector<8x128xf32> to vector<8x32xf32>
    %43 = arith.mulf %40, %25 : vector<8x32xf32>
    %44 = arith.mulf %39, %41 : vector<8x32xf32>
    %45 = arith.addf %43, %44 : vector<8x32xf32>
    %46 = math.tanh %45 : vector<8x32xf32>
    %47 = arith.mulf %42, %46 : vector<8x32xf32>
    %c2_i32 = arith.constant 2 : i32
    %48 = arith.index_cast %c2_i32 : i32 to index
    %c0_15 = arith.constant 0 : index
    %c0_16 = arith.constant 0 : index
    %49 = vector.load %arg0[%48, %c0_15, %c0_16] : memref<4x8x128xf32, #tpu.memory_space<vmem>>, vector<1x8x128xf32>
    %50 = vector.shape_cast %49 : vector<1x8x128xf32> to vector<8x128xf32>
    %cst_17 = arith.constant dense<0.000000e+00> : vector<8x128xf32>
    %51 = tpu.matmul %47, %0, %cst_17 {dimension_numbers = #tpu.dot_dimension_numbers<[1], [0], [0], [1], [0, 0, 1, 1], [], []>} : vector<8x32xf32>, vector<32x128xf32>, vector<8x128xf32> -> vector<8x128xf32>
    %52 = arith.addf %50, %51 : vector<8x128xf32>
    %53 = arith.negf %52 : vector<8x128xf32>
    %54 = math.exp %53 : vector<8x128xf32>
    %cst_18 = arith.constant 1.000000e+00 : f32
    %55 = vector.broadcast %cst_18 : f32 to vector<8x128xf32>
    %56 = arith.addf %55, %54 : vector<8x128xf32>
    %57 = arith.divf %55, %56 : vector<8x128xf32>
    %58 = math.tanh %52 : vector<8x128xf32>
    %59 = vector.extract_strided_slice %57 {offsets = [0, 0], sizes = [8, 32], strides = [1, 1]} : vector<8x128xf32> to vector<8x32xf32>
    %60 = vector.extract_strided_slice %57 {offsets = [0, 32], sizes = [8, 32], strides = [1, 1]} : vector<8x128xf32> to vector<8x32xf32>
    %61 = vector.extract_strided_slice %58 {offsets = [0, 64], sizes = [8, 32], strides = [1, 1]} : vector<8x128xf32> to vector<8x32xf32>
    %62 = vector.extract_strided_slice %57 {offsets = [0, 96], sizes = [8, 32], strides = [1, 1]} : vector<8x128xf32> to vector<8x32xf32>
    %63 = arith.mulf %60, %45 : vector<8x32xf32>
    %64 = arith.mulf %59, %61 : vector<8x32xf32>
    %65 = arith.addf %63, %64 : vector<8x32xf32>
    %66 = math.tanh %65 : vector<8x32xf32>
    %67 = arith.mulf %62, %66 : vector<8x32xf32>
    %c3_i32 = arith.constant 3 : i32
    %68 = arith.index_cast %c3_i32 : i32 to index
    %c0_19 = arith.constant 0 : index
    %c0_20 = arith.constant 0 : index
    %69 = vector.load %arg0[%68, %c0_19, %c0_20] : memref<4x8x128xf32, #tpu.memory_space<vmem>>, vector<1x8x128xf32>
    %70 = vector.shape_cast %69 : vector<1x8x128xf32> to vector<8x128xf32>
    %cst_21 = arith.constant dense<0.000000e+00> : vector<8x128xf32>
    %71 = tpu.matmul %67, %0, %cst_21 {dimension_numbers = #tpu.dot_dimension_numbers<[1], [0], [0], [1], [0, 0, 1, 1], [], []>} : vector<8x32xf32>, vector<32x128xf32>, vector<8x128xf32> -> vector<8x128xf32>
    %72 = arith.addf %70, %71 : vector<8x128xf32>
    %73 = arith.negf %72 : vector<8x128xf32>
    %74 = math.exp %73 : vector<8x128xf32>
    %cst_22 = arith.constant 1.000000e+00 : f32
    %75 = vector.broadcast %cst_22 : f32 to vector<8x128xf32>
    %76 = arith.addf %75, %74 : vector<8x128xf32>
    %77 = arith.divf %75, %76 : vector<8x128xf32>
    %78 = math.tanh %72 : vector<8x128xf32>
    %79 = vector.extract_strided_slice %77 {offsets = [0, 0], sizes = [8, 32], strides = [1, 1]} : vector<8x128xf32> to vector<8x32xf32>
    %80 = vector.extract_strided_slice %77 {offsets = [0, 32], sizes = [8, 32], strides = [1, 1]} : vector<8x128xf32> to vector<8x32xf32>
    %81 = vector.extract_strided_slice %78 {offsets = [0, 64], sizes = [8, 32], strides = [1, 1]} : vector<8x128xf32> to vector<8x32xf32>
    %82 = vector.extract_strided_slice %77 {offsets = [0, 96], sizes = [8, 32], strides = [1, 1]} : vector<8x128xf32> to vector<8x32xf32>
    %83 = arith.mulf %80, %65 : vector<8x32xf32>
    %84 = arith.mulf %79, %81 : vector<8x32xf32>
    %85 = arith.addf %83, %84 : vector<8x32xf32>
    %86 = math.tanh %85 : vector<8x32xf32>
    %87 = arith.mulf %82, %86 : vector<8x32xf32>
    %c4_i32 = arith.constant 4 : i32
    %cst_23 = arith.constant 0.000000e+00 : f32
    %88 = vector.broadcast %cst_23 : f32 to vector<8x1xf32>
    %c0_i32_24 = arith.constant 0 : i32
    %89 = arith.index_cast %c0_i32_24 : i32 to index
    %c0_25 = arith.constant 0 : index
    %c0_26 = arith.constant 0 : index
    %90 = vector.load %arg1[%89, %c0_25, %c0_26] : memref<5x8x128xf32, #tpu.memory_space<vmem>>, vector<1x8x128xf32>
    %91 = vector.shape_cast %90 : vector<1x8x128xf32> to vector<8x128xf32>
    %cst_27 = arith.constant dense<0.000000e+00> : vector<8x128xf32>
    %92 = tpu.matmul %87, %1, %cst_27 {dimension_numbers = #tpu.dot_dimension_numbers<[1], [0], [0], [1], [0, 0, 1, 1], [], []>} : vector<8x32xf32>, vector<32x128xf32>, vector<8x128xf32> -> vector<8x128xf32>
    %93 = arith.addf %91, %92 : vector<8x128xf32>
    %94 = arith.negf %93 : vector<8x128xf32>
    %95 = math.exp %94 : vector<8x128xf32>
    %cst_28 = arith.constant 1.000000e+00 : f32
    %96 = vector.broadcast %cst_28 : f32 to vector<8x128xf32>
    %97 = arith.addf %96, %95 : vector<8x128xf32>
    %98 = arith.divf %96, %97 : vector<8x128xf32>
    %99 = math.tanh %93 : vector<8x128xf32>
    %100 = vector.extract_strided_slice %98 {offsets = [0, 0], sizes = [8, 32], strides = [1, 1]} : vector<8x128xf32> to vector<8x32xf32>
    %101 = vector.extract_strided_slice %98 {offsets = [0, 32], sizes = [8, 32], strides = [1, 1]} : vector<8x128xf32> to vector<8x32xf32>
    %102 = vector.extract_strided_slice %99 {offsets = [0, 64], sizes = [8, 32], strides = [1, 1]} : vector<8x128xf32> to vector<8x32xf32>
    %103 = vector.extract_strided_slice %98 {offsets = [0, 96], sizes = [8, 32], strides = [1, 1]} : vector<8x128xf32> to vector<8x32xf32>
    %104 = arith.mulf %101, %7 : vector<8x32xf32>
    %105 = arith.mulf %100, %102 : vector<8x32xf32>
    %106 = arith.addf %104, %105 : vector<8x32xf32>
    %107 = math.tanh %106 : vector<8x32xf32>
    %108 = arith.mulf %103, %107 : vector<8x32xf32>
    %cst_29 = arith.constant dense<0.000000e+00> : vector<8x128xf32>
    %109 = tpu.matmul %108, %2, %cst_29 {dimension_numbers = #tpu.dot_dimension_numbers<[1], [0], [0], [1], [0, 0, 1, 1], [], []>} : vector<8x32xf32>, vector<32x128xf32>, vector<8x128xf32> -> vector<8x128xf32>
    %110 = arith.addf %109, %5 : vector<8x128xf32>
    %cst_30 = arith.constant dense<0xFF800000> : vector<8xf32>
    %111 = vector.multi_reduction <maximumf>, %110, %cst_30 [1] : vector<8x128xf32> to vector<8xf32>
    %112 = vector.shape_cast %111 : vector<8xf32> to vector<8x1xf32>
    %113 = vector.broadcast %112 : vector<8x1xf32> to vector<8x128xf32>
    %114 = arith.subf %110, %113 : vector<8x128xf32>
    %115 = math.exp %114 : vector<8x128xf32>
    %cst_31 = arith.constant dense<0.000000e+00> : vector<8xf32>
    %116 = vector.multi_reduction <add>, %115, %cst_31 [1] : vector<8x128xf32> to vector<8xf32>
    %117 = vector.shape_cast %116 : vector<8xf32> to vector<8x1xf32>
    %118 = math.log %117 : vector<8x1xf32>
    %119 = arith.addf %112, %118 : vector<8x1xf32>
    %120 = arith.index_cast %c0_i32_24 : i32 to index
    %c0_32 = arith.constant 0 : index
    %c0_33 = arith.constant 0 : index
    %121 = vector.load %arg2[%120, %c0_32, %c0_33] : memref<5x8x1xi32, #tpu.memory_space<vmem>>, vector<1x8x1xi32>
    %122 = vector.shape_cast %121 : vector<1x8x1xi32> to vector<8x1xi32>
    %123 = vector.broadcast %122 : vector<8x1xi32> to vector<8x128xi32>
    %124 = arith.cmpi eq, %6, %123 : vector<8x128xi32>
    %cst_34 = arith.constant 0.000000e+00 : f32
    %125 = vector.broadcast %cst_34 : f32 to vector<8x128xf32>
    %126 = arith.select %124, %110, %125 : vector<8x128xi1>, vector<8x128xf32>
    %cst_35 = arith.constant dense<0.000000e+00> : vector<8xf32>
    %127 = vector.multi_reduction <add>, %126, %cst_35 [1] : vector<8x128xf32> to vector<8xf32>
    %128 = vector.shape_cast %127 : vector<8xf32> to vector<8x1xf32>
    %129 = arith.subf %119, %128 : vector<8x1xf32>
    %130 = arith.addf %88, %129 : vector<8x1xf32>
    %c1_i32_36 = arith.constant 1 : i32
    %131 = arith.index_cast %c1_i32_36 : i32 to index
    %c0_37 = arith.constant 0 : index
    %c0_38 = arith.constant 0 : index
    %132 = vector.load %arg1[%131, %c0_37, %c0_38] : memref<5x8x128xf32, #tpu.memory_space<vmem>>, vector<1x8x128xf32>
    %133 = vector.shape_cast %132 : vector<1x8x128xf32> to vector<8x128xf32>
    %cst_39 = arith.constant dense<0.000000e+00> : vector<8x128xf32>
    %134 = tpu.matmul %108, %1, %cst_39 {dimension_numbers = #tpu.dot_dimension_numbers<[1], [0], [0], [1], [0, 0, 1, 1], [], []>} : vector<8x32xf32>, vector<32x128xf32>, vector<8x128xf32> -> vector<8x128xf32>
    %135 = arith.addf %133, %134 : vector<8x128xf32>
    %136 = arith.negf %135 : vector<8x128xf32>
    %137 = math.exp %136 : vector<8x128xf32>
    %cst_40 = arith.constant 1.000000e+00 : f32
    %138 = vector.broadcast %cst_40 : f32 to vector<8x128xf32>
    %139 = arith.addf %138, %137 : vector<8x128xf32>
    %140 = arith.divf %138, %139 : vector<8x128xf32>
    %141 = math.tanh %135 : vector<8x128xf32>
    %142 = vector.extract_strided_slice %140 {offsets = [0, 0], sizes = [8, 32], strides = [1, 1]} : vector<8x128xf32> to vector<8x32xf32>
    %143 = vector.extract_strided_slice %140 {offsets = [0, 32], sizes = [8, 32], strides = [1, 1]} : vector<8x128xf32> to vector<8x32xf32>
    %144 = vector.extract_strided_slice %141 {offsets = [0, 64], sizes = [8, 32], strides = [1, 1]} : vector<8x128xf32> to vector<8x32xf32>
    %145 = vector.extract_strided_slice %140 {offsets = [0, 96], sizes = [8, 32], strides = [1, 1]} : vector<8x128xf32> to vector<8x32xf32>
    %146 = arith.mulf %143, %106 : vector<8x32xf32>
    %147 = arith.mulf %142, %144 : vector<8x32xf32>
    %148 = arith.addf %146, %147 : vector<8x32xf32>
    %149 = math.tanh %148 : vector<8x32xf32>
    %150 = arith.mulf %145, %149 : vector<8x32xf32>
    %cst_41 = arith.constant dense<0.000000e+00> : vector<8x128xf32>
    %151 = tpu.matmul %150, %2, %cst_41 {dimension_numbers = #tpu.dot_dimension_numbers<[1], [0], [0], [1], [0, 0, 1, 1], [], []>} : vector<8x32xf32>, vector<32x128xf32>, vector<8x128xf32> -> vector<8x128xf32>
    %152 = arith.addf %151, %5 : vector<8x128xf32>
    %cst_42 = arith.constant dense<0xFF800000> : vector<8xf32>
    %153 = vector.multi_reduction <maximumf>, %152, %cst_42 [1] : vector<8x128xf32> to vector<8xf32>
    %154 = vector.shape_cast %153 : vector<8xf32> to vector<8x1xf32>
    %155 = vector.broadcast %154 : vector<8x1xf32> to vector<8x128xf32>
    %156 = arith.subf %152, %155 : vector<8x128xf32>
    %157 = math.exp %156 : vector<8x128xf32>
    %cst_43 = arith.constant dense<0.000000e+00> : vector<8xf32>
    %158 = vector.multi_reduction <add>, %157, %cst_43 [1] : vector<8x128xf32> to vector<8xf32>
    %159 = vector.shape_cast %158 : vector<8xf32> to vector<8x1xf32>
    %160 = math.log %159 : vector<8x1xf32>
    %161 = arith.addf %154, %160 : vector<8x1xf32>
    %162 = arith.index_cast %c1_i32_36 : i32 to index
    %c0_44 = arith.constant 0 : index
    %c0_45 = arith.constant 0 : index
    %163 = vector.load %arg2[%162, %c0_44, %c0_45] : memref<5x8x1xi32, #tpu.memory_space<vmem>>, vector<1x8x1xi32>
    %164 = vector.shape_cast %163 : vector<1x8x1xi32> to vector<8x1xi32>
    %165 = vector.broadcast %164 : vector<8x1xi32> to vector<8x128xi32>
    %166 = arith.cmpi eq, %6, %165 : vector<8x128xi32>
    %cst_46 = arith.constant 0.000000e+00 : f32
    %167 = vector.broadcast %cst_46 : f32 to vector<8x128xf32>
    %168 = arith.select %166, %152, %167 : vector<8x128xi1>, vector<8x128xf32>
    %cst_47 = arith.constant dense<0.000000e+00> : vector<8xf32>
    %169 = vector.multi_reduction <add>, %168, %cst_47 [1] : vector<8x128xf32> to vector<8xf32>
    %170 = vector.shape_cast %169 : vector<8xf32> to vector<8x1xf32>
    %171 = arith.subf %161, %170 : vector<8x1xf32>
    %172 = arith.addf %130, %171 : vector<8x1xf32>
    %c2_i32_48 = arith.constant 2 : i32
    %173 = arith.index_cast %c2_i32_48 : i32 to index
    %c0_49 = arith.constant 0 : index
    %c0_50 = arith.constant 0 : index
    %174 = vector.load %arg1[%173, %c0_49, %c0_50] : memref<5x8x128xf32, #tpu.memory_space<vmem>>, vector<1x8x128xf32>
    %175 = vector.shape_cast %174 : vector<1x8x128xf32> to vector<8x128xf32>
    %cst_51 = arith.constant dense<0.000000e+00> : vector<8x128xf32>
    %176 = tpu.matmul %150, %1, %cst_51 {dimension_numbers = #tpu.dot_dimension_numbers<[1], [0], [0], [1], [0, 0, 1, 1], [], []>} : vector<8x32xf32>, vector<32x128xf32>, vector<8x128xf32> -> vector<8x128xf32>
    %177 = arith.addf %175, %176 : vector<8x128xf32>
    %178 = arith.negf %177 : vector<8x128xf32>
    %179 = math.exp %178 : vector<8x128xf32>
    %cst_52 = arith.constant 1.000000e+00 : f32
    %180 = vector.broadcast %cst_52 : f32 to vector<8x128xf32>
    %181 = arith.addf %180, %179 : vector<8x128xf32>
    %182 = arith.divf %180, %181 : vector<8x128xf32>
    %183 = math.tanh %177 : vector<8x128xf32>
    %184 = vector.extract_strided_slice %182 {offsets = [0, 0], sizes = [8, 32], strides = [1, 1]} : vector<8x128xf32> to vector<8x32xf32>
    %185 = vector.extract_strided_slice %182 {offsets = [0, 32], sizes = [8, 32], strides = [1, 1]} : vector<8x128xf32> to vector<8x32xf32>
    %186 = vector.extract_strided_slice %183 {offsets = [0, 64], sizes = [8, 32], strides = [1, 1]} : vector<8x128xf32> to vector<8x32xf32>
    %187 = vector.extract_strided_slice %182 {offsets = [0, 96], sizes = [8, 32], strides = [1, 1]} : vector<8x128xf32> to vector<8x32xf32>
    %188 = arith.mulf %185, %148 : vector<8x32xf32>
    %189 = arith.mulf %184, %186 : vector<8x32xf32>
    %190 = arith.addf %188, %189 : vector<8x32xf32>
    %191 = math.tanh %190 : vector<8x32xf32>
    %192 = arith.mulf %187, %191 : vector<8x32xf32>
    %cst_53 = arith.constant dense<0.000000e+00> : vector<8x128xf32>
    %193 = tpu.matmul %192, %2, %cst_53 {dimension_numbers = #tpu.dot_dimension_numbers<[1], [0], [0], [1], [0, 0, 1, 1], [], []>} : vector<8x32xf32>, vector<32x128xf32>, vector<8x128xf32> -> vector<8x128xf32>
    %194 = arith.addf %193, %5 : vector<8x128xf32>
    %cst_54 = arith.constant dense<0xFF800000> : vector<8xf32>
    %195 = vector.multi_reduction <maximumf>, %194, %cst_54 [1] : vector<8x128xf32> to vector<8xf32>
    %196 = vector.shape_cast %195 : vector<8xf32> to vector<8x1xf32>
    %197 = vector.broadcast %196 : vector<8x1xf32> to vector<8x128xf32>
    %198 = arith.subf %194, %197 : vector<8x128xf32>
    %199 = math.exp %198 : vector<8x128xf32>
    %cst_55 = arith.constant dense<0.000000e+00> : vector<8xf32>
    %200 = vector.multi_reduction <add>, %199, %cst_55 [1] : vector<8x128xf32> to vector<8xf32>
    %201 = vector.shape_cast %200 : vector<8xf32> to vector<8x1xf32>
    %202 = math.log %201 : vector<8x1xf32>
    %203 = arith.addf %196, %202 : vector<8x1xf32>
    %204 = arith.index_cast %c2_i32_48 : i32 to index
    %c0_56 = arith.constant 0 : index
    %c0_57 = arith.constant 0 : index
    %205 = vector.load %arg2[%204, %c0_56, %c0_57] : memref<5x8x1xi32, #tpu.memory_space<vmem>>, vector<1x8x1xi32>
    %206 = vector.shape_cast %205 : vector<1x8x1xi32> to vector<8x1xi32>
    %207 = vector.broadcast %206 : vector<8x1xi32> to vector<8x128xi32>
    %208 = arith.cmpi eq, %6, %207 : vector<8x128xi32>
    %cst_58 = arith.constant 0.000000e+00 : f32
    %209 = vector.broadcast %cst_58 : f32 to vector<8x128xf32>
    %210 = arith.select %208, %194, %209 : vector<8x128xi1>, vector<8x128xf32>
    %cst_59 = arith.constant dense<0.000000e+00> : vector<8xf32>
    %211 = vector.multi_reduction <add>, %210, %cst_59 [1] : vector<8x128xf32> to vector<8xf32>
    %212 = vector.shape_cast %211 : vector<8xf32> to vector<8x1xf32>
    %213 = arith.subf %203, %212 : vector<8x1xf32>
    %214 = arith.addf %172, %213 : vector<8x1xf32>
    %c3_i32_60 = arith.constant 3 : i32
    %215 = arith.index_cast %c3_i32_60 : i32 to index
    %c0_61 = arith.constant 0 : index
    %c0_62 = arith.constant 0 : index
    %216 = vector.load %arg1[%215, %c0_61, %c0_62] : memref<5x8x128xf32, #tpu.memory_space<vmem>>, vector<1x8x128xf32>
    %217 = vector.shape_cast %216 : vector<1x8x128xf32> to vector<8x128xf32>
    %cst_63 = arith.constant dense<0.000000e+00> : vector<8x128xf32>
    %218 = tpu.matmul %192, %1, %cst_63 {dimension_numbers = #tpu.dot_dimension_numbers<[1], [0], [0], [1], [0, 0, 1, 1], [], []>} : vector<8x32xf32>, vector<32x128xf32>, vector<8x128xf32> -> vector<8x128xf32>
    %219 = arith.addf %217, %218 : vector<8x128xf32>
    %220 = arith.negf %219 : vector<8x128xf32>
    %221 = math.exp %220 : vector<8x128xf32>
    %cst_64 = arith.constant 1.000000e+00 : f32
    %222 = vector.broadcast %cst_64 : f32 to vector<8x128xf32>
    %223 = arith.addf %222, %221 : vector<8x128xf32>
    %224 = arith.divf %222, %223 : vector<8x128xf32>
    %225 = math.tanh %219 : vector<8x128xf32>
    %226 = vector.extract_strided_slice %224 {offsets = [0, 0], sizes = [8, 32], strides = [1, 1]} : vector<8x128xf32> to vector<8x32xf32>
    %227 = vector.extract_strided_slice %224 {offsets = [0, 32], sizes = [8, 32], strides = [1, 1]} : vector<8x128xf32> to vector<8x32xf32>
    %228 = vector.extract_strided_slice %225 {offsets = [0, 64], sizes = [8, 32], strides = [1, 1]} : vector<8x128xf32> to vector<8x32xf32>
    %229 = vector.extract_strided_slice %224 {offsets = [0, 96], sizes = [8, 32], strides = [1, 1]} : vector<8x128xf32> to vector<8x32xf32>
    %230 = arith.mulf %227, %190 : vector<8x32xf32>
    %231 = arith.mulf %226, %228 : vector<8x32xf32>
    %232 = arith.addf %230, %231 : vector<8x32xf32>
    %233 = math.tanh %232 : vector<8x32xf32>
    %234 = arith.mulf %229, %233 : vector<8x32xf32>
    %cst_65 = arith.constant dense<0.000000e+00> : vector<8x128xf32>
    %235 = tpu.matmul %234, %2, %cst_65 {dimension_numbers = #tpu.dot_dimension_numbers<[1], [0], [0], [1], [0, 0, 1, 1], [], []>} : vector<8x32xf32>, vector<32x128xf32>, vector<8x128xf32> -> vector<8x128xf32>
    %236 = arith.addf %235, %5 : vector<8x128xf32>
    %cst_66 = arith.constant dense<0xFF800000> : vector<8xf32>
    %237 = vector.multi_reduction <maximumf>, %236, %cst_66 [1] : vector<8x128xf32> to vector<8xf32>
    %238 = vector.shape_cast %237 : vector<8xf32> to vector<8x1xf32>
    %239 = vector.broadcast %238 : vector<8x1xf32> to vector<8x128xf32>
    %240 = arith.subf %236, %239 : vector<8x128xf32>
    %241 = math.exp %240 : vector<8x128xf32>
    %cst_67 = arith.constant dense<0.000000e+00> : vector<8xf32>
    %242 = vector.multi_reduction <add>, %241, %cst_67 [1] : vector<8x128xf32> to vector<8xf32>
    %243 = vector.shape_cast %242 : vector<8xf32> to vector<8x1xf32>
    %244 = math.log %243 : vector<8x1xf32>
    %245 = arith.addf %238, %244 : vector<8x1xf32>
    %246 = arith.index_cast %c3_i32_60 : i32 to index
    %c0_68 = arith.constant 0 : index
    %c0_69 = arith.constant 0 : index
    %247 = vector.load %arg2[%246, %c0_68, %c0_69] : memref<5x8x1xi32, #tpu.memory_space<vmem>>, vector<1x8x1xi32>
    %248 = vector.shape_cast %247 : vector<1x8x1xi32> to vector<8x1xi32>
    %249 = vector.broadcast %248 : vector<8x1xi32> to vector<8x128xi32>
    %250 = arith.cmpi eq, %6, %249 : vector<8x128xi32>
    %cst_70 = arith.constant 0.000000e+00 : f32
    %251 = vector.broadcast %cst_70 : f32 to vector<8x128xf32>
    %252 = arith.select %250, %236, %251 : vector<8x128xi1>, vector<8x128xf32>
    %cst_71 = arith.constant dense<0.000000e+00> : vector<8xf32>
    %253 = vector.multi_reduction <add>, %252, %cst_71 [1] : vector<8x128xf32> to vector<8xf32>
    %254 = vector.shape_cast %253 : vector<8xf32> to vector<8x1xf32>
    %255 = arith.subf %245, %254 : vector<8x1xf32>
    %256 = arith.addf %214, %255 : vector<8x1xf32>
    %c4_i32_72 = arith.constant 4 : i32
    %257 = arith.index_cast %c4_i32_72 : i32 to index
    %c0_73 = arith.constant 0 : index
    %c0_74 = arith.constant 0 : index
    %258 = vector.load %arg1[%257, %c0_73, %c0_74] : memref<5x8x128xf32, #tpu.memory_space<vmem>>, vector<1x8x128xf32>
    %259 = vector.shape_cast %258 : vector<1x8x128xf32> to vector<8x128xf32>
    %cst_75 = arith.constant dense<0.000000e+00> : vector<8x128xf32>
    %260 = tpu.matmul %234, %1, %cst_75 {dimension_numbers = #tpu.dot_dimension_numbers<[1], [0], [0], [1], [0, 0, 1, 1], [], []>} : vector<8x32xf32>, vector<32x128xf32>, vector<8x128xf32> -> vector<8x128xf32>
    %261 = arith.addf %259, %260 : vector<8x128xf32>
    %262 = arith.negf %261 : vector<8x128xf32>
    %263 = math.exp %262 : vector<8x128xf32>
    %cst_76 = arith.constant 1.000000e+00 : f32
    %264 = vector.broadcast %cst_76 : f32 to vector<8x128xf32>
    %265 = arith.addf %264, %263 : vector<8x128xf32>
    %266 = arith.divf %264, %265 : vector<8x128xf32>
    %267 = math.tanh %261 : vector<8x128xf32>
    %268 = vector.extract_strided_slice %266 {offsets = [0, 0], sizes = [8, 32], strides = [1, 1]} : vector<8x128xf32> to vector<8x32xf32>
    %269 = vector.extract_strided_slice %266 {offsets = [0, 32], sizes = [8, 32], strides = [1, 1]} : vector<8x128xf32> to vector<8x32xf32>
    %270 = vector.extract_strided_slice %267 {offsets = [0, 64], sizes = [8, 32], strides = [1, 1]} : vector<8x128xf32> to vector<8x32xf32>
    %271 = vector.extract_strided_slice %266 {offsets = [0, 96], sizes = [8, 32], strides = [1, 1]} : vector<8x128xf32> to vector<8x32xf32>
    %272 = arith.mulf %269, %232 : vector<8x32xf32>
    %273 = arith.mulf %268, %270 : vector<8x32xf32>
    %274 = arith.addf %272, %273 : vector<8x32xf32>
    %275 = math.tanh %274 : vector<8x32xf32>
    %276 = arith.mulf %271, %275 : vector<8x32xf32>
    %cst_77 = arith.constant dense<0.000000e+00> : vector<8x128xf32>
    %277 = tpu.matmul %276, %2, %cst_77 {dimension_numbers = #tpu.dot_dimension_numbers<[1], [0], [0], [1], [0, 0, 1, 1], [], []>} : vector<8x32xf32>, vector<32x128xf32>, vector<8x128xf32> -> vector<8x128xf32>
    %278 = arith.addf %277, %5 : vector<8x128xf32>
    %cst_78 = arith.constant dense<0xFF800000> : vector<8xf32>
    %279 = vector.multi_reduction <maximumf>, %278, %cst_78 [1] : vector<8x128xf32> to vector<8xf32>
    %280 = vector.shape_cast %279 : vector<8xf32> to vector<8x1xf32>
    %281 = vector.broadcast %280 : vector<8x1xf32> to vector<8x128xf32>
    %282 = arith.subf %278, %281 : vector<8x128xf32>
    %283 = math.exp %282 : vector<8x128xf32>
    %cst_79 = arith.constant dense<0.000000e+00> : vector<8xf32>
    %284 = vector.multi_reduction <add>, %283, %cst_79 [1] : vector<8x128xf32> to vector<8xf32>
    %285 = vector.shape_cast %284 : vector<8xf32> to vector<8x1xf32>
    %286 = math.log %285 : vector<8x1xf32>
    %287 = arith.addf %280, %286 : vector<8x1xf32>
    %288 = arith.index_cast %c4_i32_72 : i32 to index
    %c0_80 = arith.constant 0 : index
    %c0_81 = arith.constant 0 : index
    %289 = vector.load %arg2[%288, %c0_80, %c0_81] : memref<5x8x1xi32, #tpu.memory_space<vmem>>, vector<1x8x1xi32>
    %290 = vector.shape_cast %289 : vector<1x8x1xi32> to vector<8x1xi32>
    %291 = vector.broadcast %290 : vector<8x1xi32> to vector<8x128xi32>
    %292 = arith.cmpi eq, %6, %291 : vector<8x128xi32>
    %cst_82 = arith.constant 0.000000e+00 : f32
    %293 = vector.broadcast %cst_82 : f32 to vector<8x128xf32>
    %294 = arith.select %292, %278, %293 : vector<8x128xi1>, vector<8x128xf32>
    %cst_83 = arith.constant dense<0.000000e+00> : vector<8xf32>
    %295 = vector.multi_reduction <add>, %294, %cst_83 [1] : vector<8x128xf32> to vector<8xf32>
    %296 = vector.shape_cast %295 : vector<8xf32> to vector<8x1xf32>
    %297 = arith.subf %287, %296 : vector<8x1xf32>
    %298 = arith.addf %256, %297 : vector<8x1xf32>
    %c5_i32 = arith.constant 5 : i32
    %299 = tpu.iota {dimensions = array<i32: 0>} : vector<8x1xi32>
    %c4_i32_84 = arith.constant 4 : i32
    %300 = vector.broadcast %c4_i32_84 : i32 to vector<8x1xi32>
    %301 = arith.cmpi slt, %299, %300 : vector<8x1xi32>
    %302 = arith.extui %301 : vector<8x1xi1> to vector<8x1xi32>
    %303 = arith.sitofp %302 : vector<8x1xi32> to vector<8x1xf32>
    %304 = arith.mulf %298, %303 : vector<8x1xf32>
    %305 = vector.shape_cast %304 : vector<8x1xf32> to vector<1x8x1xf32>
    %cst_85 = arith.constant dense<0.000000e+00> : vector<1xf32>
    %306 = vector.multi_reduction <add>, %305, %cst_85 [1, 2] : vector<1x8x1xf32> to vector<1xf32>
    %307 = vector.shape_cast %306 : vector<1xf32> to vector<1x1x1xf32>
    %308 = vector.extract %307[0, 0, 0] : f32 from vector<1x1x1xf32>
    %cst_86 = arith.constant 4.000000e+00 : f32
    %309 = arith.divf %308, %cst_86 : f32
    %c0_87 = arith.constant 0 : index
    %c0_88 = arith.constant 0 : index
    %310 = memref.load %arg7[%c0_87, %c0_88] : memref<1x1xf32, #tpu.memory_space<smem>>
    memref.store %309, %arg7[%c0_87, %c0_88] : memref<1x1xf32, #tpu.memory_space<smem>>
    return
  }
}

</mosaic_0001>

<bundles_post_ra>
// kernel: model_forward.1
= control target key start
LH: loop header
LB: loop body
LE: loop exit
PB: predicated region body
PF: predicated region fallthrough
CT: control target
= control target key end

     0   :  { %v43_v2 = vlaneseq  ;;  %s1231_s0 = inlined_call_operand.vmem [shape: f32[4,8,128], index: 0, kind: input, shape index: {}]   ;;  %s1232_s1 = inlined_call_operand.vmem [shape: f32[5,8,128], index: 1, kind: input, shape index: {}]   ;;  %s1233_s2 = inlined_call_operand.vmem [shape: s32[5,8,1], index: 2, kind: input, shape index: {}]   ;;  %s1234_s3 = inlined_call_operand.vmem [shape: f32[32,128], index: 3, kind: input, shape index: {}]   ;;  %s1235_s4 = inlined_call_operand.vmem [shape: f32[32,128], index: 4, kind: input, shape index: {}]   ;;  %s1236_s5 = inlined_call_operand.vmem [shape: f32[32,128], index: 5, kind: input, shape index: {}]   ;;  %s1237_s6 = inlined_call_operand.vmem [shape: f32[1,128], index: 6, kind: input, shape index: {}]   ;;  %s1238_s7 = inlined_call_operand.hbm [shape: f32[1,1], index: 7, kind: output, shape index: {}]  }
   0x1   :  { %v30_v0 = vld [vmem:[%s1234_s3 + $0x18] sm:$0xff]  ;;  %v29_v1 = vld [vmem:[%s1234_s3 + $0x10] sm:$0xff]  ;;  %v28_v3 = vld [vmem:[%s1234_s3 + $0x8] sm:$0xff] }
   0x2   :  { %62 = vmatpush.msra.mxu0 %v30_v0  ;;  %127 = vmatpush.msra.mxu1 %v30_v0  ;;  %v837_v4 = vshrl.u32 %v43_v2, 7 }
   0x3   :  { %192 = vmatpush.msra.mxu2 %v30_v0  ;;  %257 = vmatpush.msra.mxu3 %v30_v0 }
   0x4   :  { %12 = vsyncpa [#allocation3], 0  ;;  %63 = vmatpush.msra.mxu0 %v29_v1  ;;  %128 = vmatpush.msra.mxu1 %v29_v1  ;;  %v27_v5 = vld [vmem:[%s1234_s3] sm:$0xff]  ;;  %vm838_vm0 = vcmp.lt.s32.totalorder %v837_v4, 4  ;;  %v1035_v6 = vmov 0.0   ;;  %s1036_s3 = smov 64  }
   0x5   :  { %193 = vmatpush.msra.mxu2 %v29_v1  ;;  %258 = vmatpush.msra.mxu3 %v29_v1  ;;  %v1094_v7 = vsel %vm838_vm0, 1.0, %v1035_v6  ;;  %v45_v8 = vld [vmem:[%s1231_s0] sm:$0xff]  ;;  %s1037_s11 = smov 32   ;;  %vm46_vm5 = vcmask 261120   ;;  %v880_v34 = vld [vmem:[%s1231_s0 + $0x8] sm:$0xff]  ;;  %v883_v60 = vld [vmem:[%s1231_s0 + $0x10] sm:$0xff] }
   0x6   :  { %64 = vmatpush.msra.mxu0 %v28_v3  ;;  %129 = vmatpush.msra.mxu1 %v28_v3  ;;  %s869_s26 = sshll.u32 %s1238_s7, 4  ;;  %s1040_s30 = smov [#allocation2]   ;;  %s870_s26 = int_to_ptr.hbm [resolvable:$true] %s869_s26 }
   0x7   :  { %194 = vmatpush.msra.mxu2 %v28_v3  ;;  %259 = vmatpush.msra.mxu3 %v28_v3 }
   0x8   :  { %65 = vmatpush.msra.mxu0 %v27_v5  ;;  %130 = vmatpush.msra.mxu1 %v27_v5 }
   0x9   :  { %66 = vmatmul.f32.vlgmr.msra.gmra.mxu0 %v1035_v6  ;;  %195 = vmatpush.msra.mxu2 %v27_v5 }
   0xa   :  { %260 = vmatpush.msra.mxu3 %v27_v5 }
  0x86   :  { %v67_v9 = vpop.f32.mrf.mxu0 }
  0x87   :  { %v70_v10 = vadd.f32 %v67_v9, %v45_v8 }
  0x89   :  { %927 = vtanh.f32 %v70_v10  ;;  %v879_v12 = vmul.f32 -1.442695, %v70_v10 }
  0x8b   :  { %929 = vpow2.f32 %v879_v12 }
  0x8f   :  { %v928_v11 = vpop.eup %927 }
  0x90   :  { %93 = vrot.lane.b32.xlu0 %v928_v11, %s1036_s3 }
  0x91   :  { %v930_v13 = vpop.eup %929 }
  0x92   :  { %v74_v14 = vadd.f32 1.0, %v930_v13 }
  0x94   :  { %931 = vrcp.f32 %v74_v14  ;;  %v86_v20 = vand.u32 2147483648, %v74_v14  ;;  %vm80_vm2 = vweird.f32 %v74_v14  ;;  %v84_v21 = vand.u32 2147483647, %v74_v14 }
  0x96   :  { %v87_v23 = vor.u32 1.1754944e-38, %v86_v20  ;;  %vm85_vm4 = vcmp.eq.f32.partialorder %v84_v21, 8.507059e+37 }
  0x9a   :  { %v932_v15 = vpop.eup %931 }
  0x9b   :  { %v76_v16 = vmul.f32 %v932_v15, %v74_v14  ;;  %vm81_vm1 = vweird.f32 %v932_v15 }
  0x9c   :  { %vm82_vm3 = vmor %vm80_vm2, %vm81_vm1 }
  0x9d   :  { %v77_v17 = vsub.f32 1.0, %v76_v16 }
  0x9f   :  { %v78_v18 = vmul.f32 %v932_v15, %v77_v17 }
  0xa1   :  { %v79_v19 = vadd.f32 %v932_v15, %v78_v18 }
  0xa3   :  { %v83_v22 = vsel %vm82_vm3, %v932_v15, %v79_v19 }
  0xa4   :  { %v88_v25 = vsel %vm85_vm4, %v87_v23, %v83_v22 }
  0xa5   :  { %v91_v27 = vmul.f32 0.0, %v88_v25 }
 0x102   :  { %v94_v24 = vpop.permute.xlu0 %93 }
 0x103   :  { %v96_v26 = vmul.f32 %v94_v24, %v88_v25  ;;  %v886_v24 = vld [vmem:[%s1231_s0 + $0x18] sm:$0xff] }
 0x105   :  { %98 = vrot.lane.b32.xlu0 %v96_v26, %s1037_s11 }
 0x177   :  { %v99_v28 = vpop.permute.xlu0 %98 }
 0x178   :  { %v101_v29 = vadd.f32 %v99_v28, %v91_v27 }
 0x17a   :  { %933 = vtanh.f32 %v101_v29 }
 0x180   :  { %v934_v30 = vpop.eup %933 }
 0x181   :  { %104 = vrot.lane.b32.xlu1 %v934_v30, %s1036_s3 }
 0x1f3   :  { %v105_v31 = vpop.permute.xlu1 %104 }
 0x1f4   :  { %v107_v32 = vmul.f32 %v105_v31, %v88_v25 }
 0x1f6   :  { %111 = vrot.lane.b32.xlu1 %v107_v32, %s1037_s11 }
 0x268   :  { %v112_v33 = vpop.permute.xlu1 %111 }
 0x269   :  { %881 = vmatmul.msk.f32.vlgmr.msra.gmra.mxu1 %vm46_vm5, %v112_v33 }
 0x2e6   :  { %v132_v35 = vpop.f32.mrf.mxu1 }
 0x2e7   :  { %v135_v36 = vadd.f32 %v880_v34, %v132_v35 }
 0x2e9   :  { %935 = vtanh.f32 %v135_v36  ;;  %v882_v38 = vmul.f32 -1.442695, %v135_v36 }
 0x2eb   :  { %937 = vpow2.f32 %v882_v38 }
 0x2ef   :  { %v936_v37 = vpop.eup %935 }
 0x2f0   :  { %158 = vrot.lane.b32.xlu2 %v936_v37, %s1036_s3 }
 0x2f1   :  { %v938_v39 = vpop.eup %937 }
 0x2f2   :  { %v139_v40 = vadd.f32 1.0, %v938_v39 }
 0x2f4   :  { %939 = vrcp.f32 %v139_v40  ;;  %v151_v46 = vand.u32 2147483648, %v139_v40  ;;  %vm145_vm7 = vweird.f32 %v139_v40  ;;  %v149_v47 = vand.u32 2147483647, %v139_v40 }
 0x2f6   :  { %v152_v49 = vor.u32 1.1754944e-38, %v151_v46  ;;  %vm150_vm9 = vcmp.eq.f32.partialorder %v149_v47, 8.507059e+37  ;;  %v34_v47 = vld [vmem:[%s1235_s4 + $0x18] sm:$0xff] }
 0x2f7   :  { %321 = vmatpush.msrb.mxu0 %v34_v47  ;;  %426 = vmatpush.msrb.mxu2 %v34_v47 }
 0x2fa   :  { %v940_v41 = vpop.eup %939 }
 0x2fb   :  { %v141_v42 = vmul.f32 %v940_v41, %v139_v40  ;;  %vm146_vm6 = vweird.f32 %v940_v41 }
 0x2fc   :  { %vm147_vm8 = vmor %vm145_vm7, %vm146_vm6 }
 0x2fd   :  { %v142_v43 = vsub.f32 1.0, %v141_v42 }
 0x2ff   :  { %v143_v44 = vmul.f32 %v940_v41, %v142_v43 }
 0x301   :  { %v144_v45 = vadd.f32 %v940_v41, %v143_v44 }
 0x303   :  { %v148_v48 = vsel %vm147_vm8, %v940_v41, %v144_v45 }
 0x304   :  { %v153_v51 = vsel %vm150_vm9, %v152_v49, %v148_v48  ;;  %v33_v48 = vld [vmem:[%s1235_s4 + $0x10] sm:$0xff]  ;;  %v32_v49 = vld [vmem:[%s1235_s4 + $0x8] sm:$0xff] }
 0x305   :  { %v156_v53 = vmul.f32 %v153_v51, %v101_v29  ;;  %322 = vmatpush.msrb.mxu0 %v33_v48  ;;  %427 = vmatpush.msrb.mxu2 %v33_v48 }
 0x307   :  { %323 = vmatpush.msrb.mxu0 %v32_v49  ;;  %428 = vmatpush.msrb.mxu2 %v32_v49 }
 0x34a   :  { %v159_v50 = vpop.permute.xlu2 %158 }
 0x34b   :  { %v161_v52 = vmul.f32 %v159_v50, %v153_v51  ;;  %v31_v50 = vld [vmem:[%s1235_s4] sm:$0xff] }
 0x34c   :  { %324 = vmatpush.msrb.mxu0 %v31_v50  ;;  %429 = vmatpush.msrb.mxu2 %v31_v50 }
 0x34d   :  { %163 = vrot.lane.b32.xlu2 %v161_v52, %s1037_s11 }
 0x34e   :  { %532 = vmatpush.msra.mxu0 %v34_v47 }
 0x350   :  { %533 = vmatpush.msra.mxu0 %v33_v48 }
 0x352   :  { %534 = vmatpush.msra.mxu0 %v32_v49 }
 0x354   :  { %535 = vmatpush.msra.mxu0 %v31_v50 }
 0x3a7   :  { %v164_v54 = vpop.permute.xlu2 %163 }
 0x3a8   :  { %v166_v55 = vadd.f32 %v164_v54, %v156_v53  ;;  %v303_v54 = vld [vmem:[%s1232_s1] sm:$0xff] }
 0x3aa   :  { %941 = vtanh.f32 %v166_v55 }
 0x3b0   :  { %v942_v56 = vpop.eup %941 }
 0x3b1   :  { %169 = vrot.lane.b32.xlu0 %v942_v56, %s1036_s3 }
 0x423   :  { %v170_v57 = vpop.permute.xlu0 %169 }
 0x424   :  { %v172_v58 = vmul.f32 %v170_v57, %v153_v51 }
 0x426   :  { %176 = vrot.lane.b32.xlu1 %v172_v58, %s1037_s11 }
 0x498   :  { %v177_v59 = vpop.permute.xlu1 %176 }
 0x499   :  { %884 = vmatmul.msk.f32.vlgmr.msra.gmra.mxu2 %vm46_vm5, %v177_v59 }
 0x49a   :  { %638 = vmatpush.msra.mxu2 %v34_v47 }
 0x49c   :  { %639 = vmatpush.msra.mxu2 %v33_v48 }
 0x49e   :  { %640 = vmatpush.msra.mxu2 %v32_v49 }
 0x4a0   :  { %641 = vmatpush.msra.mxu2 %v31_v50 }
 0x51c   :  { %v197_v61 = vpop.f32.mrf.mxu2 }
 0x51d   :  { %v200_v62 = vadd.f32 %v883_v60, %v197_v61 }
 0x51f   :  { %943 = vtanh.f32 %v200_v62  ;;  %v885_v0 = vmul.f32 -1.442695, %v200_v62 }
 0x521   :  { %945 = vpow2.f32 %v885_v0 }
 0x525   :  { %v944_v63 = vpop.eup %943 }
 0x526   :  { %223 = vrot.lane.b32.xlu2 %v944_v63, %s1036_s3 }
 0x527   :  { %v946_v1 = vpop.eup %945 }
 0x528   :  { %v204_v3 = vadd.f32 1.0, %v946_v1 }
 0x52a   :  { %947 = vrcp.f32 %v204_v3  ;;  %v216_v10 = vand.u32 2147483648, %v204_v3  ;;  %vm210_vm11 = vweird.f32 %v204_v3  ;;  %v214_v11 = vand.u32 2147483647, %v204_v3 }
 0x52c   :  { %v217_v13 = vor.u32 1.1754944e-38, %v216_v10  ;;  %vm215_vm13 = vcmp.eq.f32.partialorder %v214_v11, 8.507059e+37 }
 0x530   :  { %v948_v4 = vpop.eup %947 }
 0x531   :  { %v206_v5 = vmul.f32 %v948_v4, %v204_v3  ;;  %vm211_vm10 = vweird.f32 %v948_v4 }
 0x532   :  { %vm212_vm12 = vmor %vm210_vm11, %vm211_vm10 }
 0x533   :  { %v207_v6 = vsub.f32 1.0, %v206_v5 }
 0x535   :  { %v208_v8 = vmul.f32 %v948_v4, %v207_v6 }
 0x537   :  { %v209_v9 = vadd.f32 %v948_v4, %v208_v8 }
 0x539   :  { %v213_v12 = vsel %vm212_vm12, %v948_v4, %v209_v9 }
 0x53a   :  { %v218_v15 = vsel %vm215_vm13, %v217_v13, %v213_v12 }
 0x53b   :  { %v221_v17 = vmul.f32 %v218_v15, %v166_v55 }
 0x580   :  { %v224_v14 = vpop.permute.xlu2 %223 }
 0x581   :  { %v226_v16 = vmul.f32 %v224_v14, %v218_v15 }
 0x583   :  { %228 = vrot.lane.b32.xlu0 %v226_v16, %s1037_s11  ;;  %v37_v16 = vld [vmem:[%s1236_s5 + $0x10] sm:$0xff] }
 0x5f5   :  { %v229_v18 = vpop.permute.xlu0 %228 }
 0x5f6   :  { %v231_v19 = vadd.f32 %v229_v18, %v221_v17  ;;  %v36_v17 = vld [vmem:[%s1236_s5 + $0x8] sm:$0xff]  ;;  %v35_v18 = vld [vmem:[%s1236_s5] sm:$0xff] }
 0x5f8   :  { %949 = vtanh.f32 %v231_v19 }
 0x5fe   :  { %v950_v20 = vpop.eup %949 }
 0x5ff   :  { %234 = vrot.lane.b32.xlu1 %v950_v20, %s1036_s3 }
 0x671   :  { %v235_v21 = vpop.permute.xlu1 %234 }
 0x672   :  { %v237_v22 = vmul.f32 %v235_v21, %v218_v15  ;;  %v38_v15 = vld [vmem:[%s1236_s5 + $0x18] sm:$0xff] }
 0x673   :  { %384 = vmatpush.msrb.mxu1 %v38_v15  ;;  %489 = vmatpush.msrb.mxu3 %v38_v15 }
 0x674   :  { %241 = vrot.lane.b32.xlu2 %v237_v22, %s1037_s11  ;;  %v892_v22 = vld [vmem:[%s1232_s1 + $0x8] sm:$0xff] }
 0x675   :  { %385 = vmatpush.msrb.mxu1 %v37_v16  ;;  %490 = vmatpush.msrb.mxu3 %v37_v16 }
 0x677   :  { %386 = vmatpush.msrb.mxu1 %v36_v17  ;;  %491 = vmatpush.msrb.mxu3 %v36_v17 }
 0x679   :  { %387 = vmatpush.msrb.mxu1 %v35_v18  ;;  %492 = vmatpush.msrb.mxu3 %v35_v18 }
 0x67b   :  { %595 = vmatpush.msra.mxu1 %v38_v15 }
 0x67d   :  { %596 = vmatpush.msra.mxu1 %v37_v16 }
 0x67f   :  { %597 = vmatpush.msra.mxu1 %v36_v17 }
 0x681   :  { %598 = vmatpush.msra.mxu1 %v35_v18 }
 0x6ce   :  { %v242_v23 = vpop.permute.xlu2 %241 }
 0x6cf   :  { %887 = vmatmul.msk.f32.vlgmr.msra.gmra.mxu3 %vm46_vm5, %v242_v23 }
 0x6d0   :  { %701 = vmatpush.msra.mxu3 %v38_v15 }
 0x6d2   :  { %702 = vmatpush.msra.mxu3 %v37_v16 }
 0x6d4   :  { %703 = vmatpush.msra.mxu3 %v36_v17 }
 0x6d6   :  { %704 = vmatpush.msra.mxu3 %v35_v18 }
 0x752   :  { %v262_v25 = vpop.f32.mrf.mxu3 }
 0x753   :  { %v265_v26 = vadd.f32 %v886_v24, %v262_v25 }
 0x755   :  { %951 = vtanh.f32 %v265_v26  ;;  %v888_v28 = vmul.f32 -1.442695, %v265_v26 }
 0x757   :  { %953 = vpow2.f32 %v888_v28 }
 0x75b   :  { %v952_v27 = vpop.eup %951 }
 0x75c   :  { %288 = vrot.lane.b32.xlu0 %v952_v27, %s1036_s3 }
 0x75d   :  { %v954_v29 = vpop.eup %953 }
 0x75e   :  { %v269_v30 = vadd.f32 1.0, %v954_v29 }
 0x760   :  { %955 = vrcp.f32 %v269_v30  ;;  %v281_v36 = vand.u32 2147483648, %v269_v30  ;;  %vm275_vm15 = vweird.f32 %v269_v30  ;;  %v279_v37 = vand.u32 2147483647, %v269_v30 }
 0x762   :  { %v282_v39 = vor.u32 1.1754944e-38, %v281_v36  ;;  %vm280_vm1 = vcmp.eq.f32.partialorder %v279_v37, 8.507059e+37 }
 0x766   :  { %v956_v31 = vpop.eup %955 }
 0x767   :  { %v271_v32 = vmul.f32 %v956_v31, %v269_v30  ;;  %vm276_vm14 = vweird.f32 %v956_v31 }
 0x768   :  { %vm277_vm0 = vmor %vm275_vm15, %vm276_vm14 }
 0x769   :  { %v272_v33 = vsub.f32 1.0, %v271_v32 }
 0x76b   :  { %v273_v34 = vmul.f32 %v956_v31, %v272_v33 }
 0x76d   :  { %v274_v35 = vadd.f32 %v956_v31, %v273_v34 }
 0x76f   :  { %v278_v38 = vsel %vm277_vm0, %v956_v31, %v274_v35 }
 0x770   :  { %v283_v41 = vsel %vm280_vm1, %v282_v39, %v278_v38 }
 0x771   :  { %v286_v43 = vmul.f32 %v283_v41, %v231_v19 }
 0x7ce   :  { %v289_v40 = vpop.permute.xlu0 %288 }
 0x7cf   :  { %v291_v42 = vmul.f32 %v289_v40, %v283_v41 }
 0x7d1   :  { %293 = vrot.lane.b32.xlu1 %v291_v42, %s1037_s11 }
 0x843   :  { %v294_v44 = vpop.permute.xlu1 %293 }
 0x844   :  { %v296_v45 = vadd.f32 %v294_v44, %v286_v43 }
 0x846   :  { %957 = vtanh.f32 %v296_v45 }
 0x84c   :  { %v958_v46 = vpop.eup %957 }
 0x84d   :  { %299 = vrot.lane.b32.xlu2 %v958_v46, %s1036_s3 }
 0x8a7   :  { %v300_v51 = vpop.permute.xlu2 %299 }
 0x8a8   :  { %v302_v52 = vmul.f32 %v300_v51, %v283_v41 }
 0x8aa   :  { %305 = vrot.lane.b32.xlu0 %v302_v52, %s1037_s11 }
 0x91c   :  { %v306_v53 = vpop.permute.xlu0 %305 }
 0x91d   :  { %889 = vmatmul.msk.f32.vlgmr.msrb.gmra.mxu0 %vm46_vm5, %v306_v53 }
 0x91e   :  { %744 = vmatpush.msrb.mxu0 %v34_v47 }
 0x920   :  { %745 = vmatpush.msrb.mxu0 %v33_v48  ;;  %v897_v48 = vld [vmem:[%s1232_s1 + $0x10] sm:$0xff] }
 0x922   :  { %746 = vmatpush.msrb.mxu0 %v32_v49 }
 0x924   :  { %747 = vmatpush.msrb.mxu0 %v31_v50 }
 0x99a   :  { %v326_v55 = vpop.f32.mrf.mxu0 }
 0x99b   :  { %v329_v56 = vadd.f32 %v326_v55, %v303_v54 }
 0x99d   :  { %959 = vtanh.f32 %v329_v56  ;;  %v890_v58 = vmul.f32 -1.442695, %v329_v56 }
 0x99f   :  { %961 = vpow2.f32 %v890_v58 }
 0x9a3   :  { %v960_v57 = vpop.eup %959 }
 0x9a4   :  { %352 = vrot.lane.b32.xlu1 %v960_v57, %s1036_s3 }
 0x9a5   :  { %v962_v59 = vpop.eup %961 }
 0x9a6   :  { %v333_v60 = vadd.f32 1.0, %v962_v59 }
 0x9a8   :  { %963 = vrcp.f32 %v333_v60  ;;  %v345_v3 = vand.u32 2147483648, %v333_v60  ;;  %vm339_vm3 = vweird.f32 %v333_v60  ;;  %v343_v4 = vand.u32 2147483647, %v333_v60 }
 0x9aa   :  { %v346_v6 = vor.u32 1.1754944e-38, %v345_v3  ;;  %vm344_vm6 = vcmp.eq.f32.partialorder %v343_v4, 8.507059e+37 }
 0x9ae   :  { %v964_v61 = vpop.eup %963 }
 0x9af   :  { %v335_v62 = vmul.f32 %v964_v61, %v333_v60  ;;  %vm340_vm2 = vweird.f32 %v964_v61 }
 0x9b0   :  { %vm341_vm4 = vmor %vm339_vm3, %vm340_vm2 }
 0x9b1   :  { %v336_v63 = vsub.f32 1.0, %v335_v62 }
 0x9b3   :  { %v337_v0 = vmul.f32 %v964_v61, %v336_v63 }
 0x9b5   :  { %v338_v1 = vadd.f32 %v964_v61, %v337_v0 }
 0x9b7   :  { %v342_v5 = vsel %vm341_vm4, %v964_v61, %v338_v1 }
 0x9b8   :  { %v347_v9 = vsel %vm344_vm6, %v346_v6, %v342_v5 }
 0x9b9   :  { %v350_v11 = vmul.f32 0.0, %v347_v9 }
 0xa16   :  { %v353_v8 = vpop.permute.xlu1 %352 }
 0xa17   :  { %v355_v10 = vmul.f32 %v353_v8, %v347_v9 }
 0xa19   :  { %357 = vrot.lane.b32.xlu2 %v355_v10, %s1037_s11 }
 0xa73   :  { %v358_v12 = vpop.permute.xlu2 %357 }
 0xa74   :  { %v360_v13 = vadd.f32 %v358_v12, %v350_v11  ;;  %v902_v12 = vld [vmem:[%s1232_s1 + $0x18] sm:$0xff] }
 0xa76   :  { %965 = vtanh.f32 %v360_v13 }
 0xa7c   :  { %v966_v14 = vpop.eup %965 }
 0xa7d   :  { %363 = vrot.lane.b32.xlu0 %v966_v14, %s1036_s3 }
 0xaef   :  { %v364_v19 = vpop.permute.xlu0 %363 }
 0xaf0   :  { %v366_v20 = vmul.f32 %v364_v19, %v347_v9 }
 0xaf2   :  { %368 = vrot.lane.b32.xlu1 %v366_v20, %s1037_s11 }
 0xb64   :  { %v369_v21 = vpop.permute.xlu1 %368 }
 0xb65   :  { %891 = vmatmul.msk.f32.vlgmr.msrb.gmra.mxu1 %vm46_vm5, %v369_v21  ;;  %893 = vmatmul.msk.f32.vlgmr.msrb.gmra.mxu2 %vm46_vm5, %v369_v21 }
 0xb66   :  { %807 = vmatpush.msrb.mxu1 %v38_v15 }
 0xb68   :  { %808 = vmatpush.msrb.mxu1 %v37_v16 }
 0xb6a   :  { %809 = vmatpush.msrb.mxu1 %v36_v17 }
 0xb6c   :  { %810 = vmatpush.msrb.mxu1 %v35_v18 }
 0xbe8   :  { %v431_v23 = vpop.f32.mrf.mxu2 }
 0xbe9   :  { %v434_v24 = vadd.f32 %v892_v22, %v431_v23 }
 0xbeb   :  { %967 = vtanh.f32 %v434_v24  ;;  %v894_v26 = vmul.f32 -1.442695, %v434_v24 }
 0xbed   :  { %969 = vpow2.f32 %v894_v26 }
 0xbf1   :  { %v968_v25 = vpop.eup %967 }
 0xbf2   :  { %457 = vrot.lane.b32.xlu2 %v968_v25, %s1036_s3 }
 0xbf3   :  { %v970_v27 = vpop.eup %969 }
 0xbf4   :  { %v438_v28 = vadd.f32 1.0, %v970_v27 }
 0xbf6   :  { %971 = vrcp.f32 %v438_v28  ;;  %v450_v34 = vand.u32 2147483648, %v438_v28  ;;  %vm444_vm8 = vweird.f32 %v438_v28  ;;  %v448_v35 = vand.u32 2147483647, %v438_v28 }
 0xbf8   :  { %v451_v37 = vor.u32 1.1754944e-38, %v450_v34  ;;  %vm449_vm10 = vcmp.eq.f32.partialorder %v448_v35, 8.507059e+37 }
 0xbfc   :  { %v972_v29 = vpop.eup %971 }
 0xbfd   :  { %v440_v30 = vmul.f32 %v972_v29, %v438_v28  ;;  %vm445_vm7 = vweird.f32 %v972_v29 }
 0xbfe   :  { %vm446_vm9 = vmor %vm444_vm8, %vm445_vm7 }
 0xbff   :  { %v441_v31 = vsub.f32 1.0, %v440_v30 }
 0xc01   :  { %v442_v32 = vmul.f32 %v972_v29, %v441_v31 }
 0xc03   :  { %v443_v33 = vadd.f32 %v972_v29, %v442_v32 }
 0xc05   :  { %v447_v36 = vsel %vm446_vm9, %v972_v29, %v443_v33 }
 0xc06   :  { %v452_v39 = vsel %vm449_vm10, %v451_v37, %v447_v36 }
 0xc07   :  { %v455_v41 = vmul.f32 %v452_v39, %v360_v13 }
 0xc4c   :  { %v458_v38 = vpop.permute.xlu2 %457 }
 0xc4d   :  { %v460_v40 = vmul.f32 %v458_v38, %v452_v39  ;;  %v907_v38 = vld [vmem:[%s1232_s1 + $0x20] sm:$0xff] }
 0xc4f   :  { %462 = vrot.lane.b32.xlu0 %v460_v40, %s1037_s11 }
 0xcc1   :  { %v463_v42 = vpop.permute.xlu0 %462 }
 0xcc2   :  { %v465_v43 = vadd.f32 %v463_v42, %v455_v41 }
 0xcc4   :  { %973 = vtanh.f32 %v465_v43 }
 0xcca   :  { %v974_v44 = vpop.eup %973 }
 0xccb   :  { %468 = vrot.lane.b32.xlu1 %v974_v44, %s1036_s3 }
 0xd3d   :  { %v469_v45 = vpop.permute.xlu1 %468 }
 0xd3e   :  { %v471_v46 = vmul.f32 %v469_v45, %v452_v39 }
 0xd40   :  { %473 = vrot.lane.b32.xlu2 %v471_v46, %s1037_s11 }
 0xd9a   :  { %v474_v47 = vpop.permute.xlu2 %473 }
 0xd9b   :  { %895 = vmatmul.msk.f32.vlgmr.msrb.gmra.mxu3 %vm46_vm5, %v474_v47  ;;  %898 = vmatmul.msk.f32.vlgmr.msra.gmra.mxu0 %vm46_vm5, %v474_v47 }
 0xe18   :  { %v537_v49 = vpop.f32.mrf.mxu0 }
 0xe19   :  { %v540_v50 = vadd.f32 %v897_v48, %v537_v49 }
 0xe1b   :  { %975 = vtanh.f32 %v540_v50  ;;  %v899_v52 = vmul.f32 -1.442695, %v540_v50 }
 0xe1d   :  { %977 = vpow2.f32 %v899_v52 }
 0xe21   :  { %v976_v51 = vpop.eup %975 }
 0xe22   :  { %563 = vrot.lane.b32.xlu0 %v976_v51, %s1036_s3 }
 0xe23   :  { %v978_v53 = vpop.eup %977 }
 0xe24   :  { %v544_v54 = vadd.f32 1.0, %v978_v53 }
 0xe26   :  { %979 = vrcp.f32 %v544_v54  ;;  %v556_v60 = vand.u32 2147483648, %v544_v54  ;;  %vm550_vm12 = vweird.f32 %v544_v54  ;;  %v554_v61 = vand.u32 2147483647, %v544_v54 }
 0xe28   :  { %v557_v63 = vor.u32 1.1754944e-38, %v556_v60  ;;  %vm555_vm14 = vcmp.eq.f32.partialorder %v554_v61, 8.507059e+37 }
 0xe2c   :  { %v980_v55 = vpop.eup %979 }
 0xe2d   :  { %v546_v56 = vmul.f32 %v980_v55, %v544_v54  ;;  %vm551_vm11 = vweird.f32 %v980_v55 }
 0xe2e   :  { %vm552_vm13 = vmor %vm550_vm12, %vm551_vm11  ;;  %vm842_vm12 = vcmask 7168  }
 0xe2f   :  { %v547_v57 = vsub.f32 1.0, %v546_v56 }
 0xe31   :  { %v548_v58 = vmul.f32 %v980_v55, %v547_v57  ;;  %v1038_v57 = vmov 0  }
 0xe32   :  { %924 = vset.pattern.permute.xlu0 %v1038_v57  ;;  %925 = vset.pattern.permute.xlu1 %v1038_v57 }
 0xe33   :  { %v549_v59 = vadd.f32 %v980_v55, %v548_v58  ;;  %923 = vset.pattern.permute.xlu2 %v1038_v57  ;;  %v926_v58 = vld [vmem:[%s1237_s6] ss:$0 sm:$0xff] }
 0xe35   :  { %v553_v62 = vsel %vm552_vm13, %v980_v55, %v549_v59  ;;  %v389_v59 = vpop.f32.mrf.mxu1 }
 0xe36   :  { %v558_v1 = vsel %vm555_vm14, %v557_v63, %v553_v62  ;;  %v390_v60 = vadd.f32 %v926_v58, %v389_v59  ;;  %v896_v63 = vld [vmem:[%s1233_s2 + $0x8] sm:$0xff] }
 0xe37   :  { %v561_v4 = vmul.f32 %v558_v1, %v465_v43 }
 0xe94   :  { %v564_v0 = vpop.permute.xlu0 %563 }
 0xe95   :  { %v566_v3 = vmul.f32 %v564_v0, %v558_v1 }
 0xe97   :  { %568 = vrot.lane.b32.xlu1 %v566_v3, %s1037_s11 }
 0xf09   :  { %v569_v5 = vpop.permute.xlu1 %568 }
 0xf0a   :  { %v571_v6 = vadd.f32 %v569_v5, %v561_v4 }
 0xf0c   :  { %981 = vtanh.f32 %v571_v6 }
 0xf12   :  { %v982_v8 = vpop.eup %981 }
 0xf13   :  { %574 = vrot.lane.b32.xlu2 %v982_v8, %s1036_s3 }
 0xf6d   :  { %v575_v9 = vpop.permute.xlu2 %574 }
 0xf6e   :  { %v577_v10 = vmul.f32 %v575_v9, %v558_v1  ;;  %v494_v9 = vpop.f32.mrf.mxu3 }
 0xf70   :  { %579 = vrot.lane.b32.xlu0 %v577_v10, %s1037_s11 }
 0xfe2   :  { %v580_v11 = vpop.permute.xlu0 %579 }
 0xfe3   :  { %900 = vmatmul.msk.f32.vlgmr.msra.gmra.mxu1 %vm46_vm5, %v580_v11  ;;  %903 = vmatmul.msk.f32.vlgmr.msra.gmra.mxu2 %vm46_vm5, %v580_v11 }
0x1060   :  { %v600_v61 = vpop.f32.mrf.mxu1 }
0x1061   :  { %v601_v62 = vadd.f32 %v926_v58, %v600_v61 }
0x1066   :  { %v643_v13 = vpop.f32.mrf.mxu2 }
0x1067   :  { %v646_v14 = vadd.f32 %v902_v12, %v643_v13  ;;  %v901_v13 = vld [vmem:[%s1233_s2 + $0x10] sm:$0xff] }
0x1069   :  { %983 = vtanh.f32 %v646_v14  ;;  %v904_v16 = vmul.f32 -1.442695, %v646_v14  ;;  %v911_v14 = vld [vmem:[%s1233_s2 + $0x20] sm:$0xff] }
0x106b   :  { %985 = vpow2.f32 %v904_v16 }
0x106f   :  { %v984_v15 = vpop.eup %983 }
0x1070   :  { %669 = vrot.lane.b32.xlu1 %v984_v15, %s1036_s3 }
0x1071   :  { %v986_v17 = vpop.eup %985 }
0x1072   :  { %v650_v18 = vadd.f32 1.0, %v986_v17 }
0x1074   :  { %987 = vrcp.f32 %v650_v18  ;;  %v662_v24 = vand.u32 2147483648, %v650_v18  ;;  %vm656_vm0 = vweird.f32 %v650_v18  ;;  %v660_v25 = vand.u32 2147483647, %v650_v18 }
0x1076   :  { %v663_v27 = vor.u32 1.1754944e-38, %v662_v24  ;;  %vm661_vm2 = vcmp.eq.f32.partialorder %v660_v25, 8.507059e+37 }
0x107a   :  { %v988_v19 = vpop.eup %987 }
0x107b   :  { %v652_v20 = vmul.f32 %v988_v19, %v650_v18  ;;  %vm657_vm15 = vweird.f32 %v988_v19 }
0x107c   :  { %vm658_vm1 = vmor %vm656_vm0, %vm657_vm15 }
0x107d   :  { %v653_v21 = vsub.f32 1.0, %v652_v20  ;;  %v402_v20 = vld [vmem:[%s1233_s2] sm:$0xff] }
0x107f   :  { %v654_v22 = vmul.f32 %v988_v19, %v653_v21 }
0x1081   :  { %v655_v23 = vadd.f32 %v988_v19, %v654_v22 }
0x1083   :  { %v659_v26 = vsel %vm658_vm1, %v988_v19, %v655_v23  ;;  %v495_v23 = vadd.f32 %v926_v58, %v494_v9 }
0x1084   :  { %v664_v29 = vsel %vm661_vm2, %v663_v27, %v659_v26 }
0x1085   :  { %v667_v31 = vmul.f32 %v664_v29, %v571_v6 }
0x10e2   :  { %v670_v28 = vpop.permute.xlu1 %669 }
0x10e3   :  { %v672_v30 = vmul.f32 %v670_v28, %v664_v29  ;;  %v44_v28 = vand.u32 127, %v43_v2 }
0x10e5   :  { %674 = vrot.lane.b32.xlu2 %v672_v30, %s1037_s11 }
0x113f   :  { %v675_v32 = vpop.permute.xlu2 %674 }
0x1140   :  { %v677_v33 = vadd.f32 %v675_v32, %v667_v31 }
0x1142   :  { %989 = vtanh.f32 %v677_v33 }
0x1148   :  { %v990_v34 = vpop.eup %989 }
0x1149   :  { %680 = vrot.lane.b32.xlu0 %v990_v34, %s1036_s3 }
0x11bb   :  { %v681_v35 = vpop.permute.xlu0 %680 }
0x11bc   :  { %v683_v36 = vmul.f32 %v681_v35, %v664_v29 }
0x11be   :  { %685 = vrot.lane.b32.xlu1 %v683_v36, %s1037_s11  ;;  %v906_v36 = vld [vmem:[%s1233_s2 + $0x18] sm:$0xff] }
0x1230   :  { %v686_v37 = vpop.permute.xlu1 %685 }
0x1231   :  { %905 = vmatmul.msk.f32.vlgmr.msra.gmra.mxu3 %vm46_vm5, %v686_v37  ;;  %908 = vmatmul.msk.f32.vlgmr.msrb.gmra.mxu0 %vm46_vm5, %v686_v37 }
0x12ae   :  { %v749_v39 = vpop.f32.mrf.mxu0 }
0x12af   :  { %v752_v40 = vadd.f32 %v907_v38, %v749_v39 }
0x12b1   :  { %991 = vtanh.f32 %v752_v40  ;;  %v909_v42 = vmul.f32 -1.442695, %v752_v40 }
0x12b3   :  { %993 = vpow2.f32 %v909_v42 }
0x12b4   :  { %v706_v11 = vpop.f32.mrf.mxu3 }
0x12b5   :  { %v707_v12 = vadd.f32 %v926_v58, %v706_v11 }
0x12b7   :  { %v992_v41 = vpop.eup %991 }
0x12b8   :  { %775 = vrot.lane.b32.xlu2 %v992_v41, %s1036_s3 }
0x12b9   :  { %v994_v43 = vpop.eup %993 }
0x12ba   :  { %v756_v44 = vadd.f32 1.0, %v994_v43 }
0x12bc   :  { %995 = vrcp.f32 %v756_v44  ;;  %v768_v50 = vand.u32 2147483648, %v756_v44  ;;  %vm762_vm4 = vweird.f32 %v756_v44  ;;  %v766_v51 = vand.u32 2147483647, %v756_v44 }
0x12be   :  { %v769_v53 = vor.u32 1.1754944e-38, %v768_v50  ;;  %vm767_vm7 = vcmp.eq.f32.partialorder %v766_v51, 8.507059e+37 }
0x12c2   :  { %v996_v45 = vpop.eup %995 }
0x12c3   :  { %v758_v46 = vmul.f32 %v996_v45, %v756_v44  ;;  %vm763_vm3 = vweird.f32 %v996_v45 }
0x12c4   :  { %vm764_vm6 = vmor %vm762_vm4, %vm763_vm3 }
0x12c5   :  { %v759_v47 = vsub.f32 1.0, %v758_v46 }
0x12c7   :  { %v760_v48 = vmul.f32 %v996_v45, %v759_v47 }
0x12c9   :  { %v761_v49 = vadd.f32 %v996_v45, %v760_v48 }
0x12cb   :  { %v765_v52 = vsel %vm764_vm6, %v996_v45, %v761_v49 }
0x12cc   :  { %v770_v55 = vsel %vm767_vm7, %v769_v53, %v765_v52 }
0x12cd   :  { %v773_v0 = vmul.f32 %v770_v55, %v677_v33 }
0x1312   :  { %v776_v54 = vpop.permute.xlu2 %775 }
0x1313   :  { %v778_v56 = vmul.f32 %v776_v54, %v770_v55 }
0x1315   :  { %780 = vrot.lane.b32.xlu0 %v778_v56, %s1037_s11 }
0x133f   :  { %392 = vmax.xlane.f32.xlu0 %v390_v60 }
0x1347   :  { %603 = vmax.xlane.f32.xlu0 %v601_v62 }
0x135b   :  { %510 = vperm.xlu0 %924, %v896_v63  }
0x1387   :  { %v781_v1 = vpop.permute.xlu0 %780 }
0x1388   :  { %v783_v3 = vadd.f32 %v781_v1, %v773_v0 }
0x138a   :  { %997 = vtanh.f32 %v783_v3 }
0x1390   :  { %v998_v4 = vpop.eup %997 }
0x1391   :  { %786 = vrot.lane.b32.xlu1 %v998_v4, %s1036_s3 }
0x13b2   :  { %v1200_v5 = vpop.xlane.xlu0 %392 }
0x13b3   :  { %v394_v6 = vsub.f32 %v390_v60, %v1200_v5 }
0x13b5   :  { %v395_v8 = vmul.f32 1.442695, %v394_v6 }
0x13b7   :  { %999 = vpow2.f32 %v395_v8 }
0x13ba   :  { %v1209_v15 = vpop.xlane.xlu0 %603 }
0x13bb   :  { %v605_v16 = vsub.f32 %v601_v62, %v1209_v15 }
0x13bd   :  { %v1000_v10 = vpop.eup %999  ;;  %v606_v19 = vmul.f32 1.442695, %v605_v16 }
0x13be   :  { %397 = vadd.xlane.f32.xlu1 %v1000_v10 }
0x13bf   :  { %1001 = vpow2.f32 %v606_v19 }
0x13c5   :  { %v1002_v21 = vpop.eup %1001 }
0x13c6   :  { %709 = vmax.xlane.f32.xlu1 %v707_v12 }
0x13cd   :  { %v511_v46 = vpop.permute.xlu0 %510 }
0x13ce   :  { %vm512_vm10 = vcmp.eq.s32.totalorder %v44_v28, %v511_v46 }
0x13cf   :  { %v513_v47 = vsel %vm512_vm10, %v495_v23, 0.0 }
0x13df   :  { %616 = vperm.xlu1 %925, %v901_v13  }
0x13e7   :  { %828 = vperm.xlu1 %925, %v911_v14  }
0x1403   :  { %v787_v17 = vpop.permute.xlu1 %786 }
0x1404   :  { %v789_v18 = vmul.f32 %v787_v17, %v770_v55 }
0x1406   :  { %791 = vrot.lane.b32.xlu2 %v789_v18, %s1037_s11 }
0x140e   :  { %404 = vperm.xlu2 %923, %v402_v20  }
0x1411   :  { %608 = vadd.xlane.f32.xlu1 %v1002_v21 }
0x1431   :  { %v398_v22 = vpop.xlane.xlu1 %397 }
0x1437   :  { %497 = vmax.xlane.f32.xlu2 %v495_v23 }
0x1439   :  { %v1216_v24 = vpop.xlane.xlu1 %709 }
0x143a   :  { %v711_v25 = vsub.f32 %v707_v12, %v1216_v24 }
0x143c   :  { %v712_v26 = vmul.f32 1.442695, %v711_v25 }
0x143e   :  { %1003 = vpow2.f32 %v712_v26 }
0x1444   :  { %v1004_v27 = vpop.eup %1003 }
0x1445   :  { %714 = vadd.xlane.f32.xlu0 %v1004_v27 }
0x1451   :  { %v617_v29 = vpop.permute.xlu1 %616 }
0x1452   :  { %vm618_vm8 = vcmp.eq.s32.totalorder %v44_v28, %v617_v29 }
0x1453   :  { %v619_v30 = vsel %vm618_vm8, %v601_v62, 0.0 }
0x1454   :  { %620 = vadd.xlane.f32.xlu0 %v619_v30 }
0x1459   :  { %v829_v48 = vpop.permute.xlu1 %828 }
0x145a   :  { %vm830_vm11 = vcmp.eq.s32.totalorder %v44_v28, %v829_v48 }
0x1460   :  { %v792_v31 = vpop.permute.xlu2 %791 }
0x1461   :  { %910 = vmatmul.msk.f32.vlgmr.msrb.gmra.mxu1 %vm46_vm5, %v792_v31 }
0x1468   :  { %v405_v32 = vpop.permute.xlu2 %404 }
0x1469   :  { %vm406_vm9 = vcmp.eq.s32.totalorder %v44_v28, %v405_v32 }
0x146a   :  { %v407_v33 = vsel %vm406_vm9, %v390_v60, 0.0 }
0x146b   :  { %408 = vadd.xlane.f32.xlu1 %v407_v33 }
0x1484   :  { %v609_v51 = vpop.xlane.xlu1 %608 }
0x14aa   :  { %v498_v2 = vpop.xlane.xlu2 %497 }
0x14ab   :  { %v499_v37 = vsub.f32 %v495_v23, %v498_v2 }
0x14ad   :  { %v500_v38 = vmul.f32 1.442695, %v499_v37 }
0x14af   :  { %1005 = vpow2.f32 %v500_v38 }
0x14b5   :  { %v1006_v39 = vpop.eup %1005 }
0x14b8   :  { %v715_v52 = vpop.xlane.xlu0 %714 }
0x14c7   :  { %v621_v1 = vpop.xlane.xlu0 %620 }
0x14de   :  { %v812_v34 = vpop.f32.mrf.mxu1  ;;  %v409_v59 = vpop.xlane.xlu1 %408 }
0x14df   :  { %v813_v35 = vadd.f32 %v926_v58, %v812_v34 }
0x14e1   :  { %815 = vmax.xlane.f32.xlu2 %v813_v35  ;;  %v831_v49 = vsel %vm830_vm11, %v813_v35, 0.0 }
0x14f9   :  { %722 = vperm.xlu2 %923, %v906_v36  }
0x1522   :  { %502 = vadd.xlane.f32.xlu2 %v1006_v39 }
0x1554   :  { %v816_v40 = vpop.xlane.xlu2 %815 }
0x1555   :  { %v817_v41 = vsub.f32 %v813_v35, %v816_v40 }
0x1557   :  { %v818_v42 = vmul.f32 1.442695, %v817_v41 }
0x1559   :  { %1007 = vpow2.f32 %v818_v42 }
0x155a   :  { %1009 = vlog2.f32 %v398_v22 }
0x155c   :  { %v723_v43 = vpop.permute.xlu2 %722 }
0x155d   :  { %vm724_vm5 = vcmp.eq.s32.totalorder %v44_v28, %v723_v43 }
0x155e   :  { %v725_v44 = vsel %vm724_vm5, %v707_v12, 0.0 }
0x155f   :  { %v1008_v45 = vpop.eup %1007  ;;  %726 = vadd.xlane.f32.xlu1 %v725_v44 }
0x1560   :  { %820 = vadd.xlane.f32.xlu2 %v1008_v45  ;;  %v1010_v53 = vpop.eup %1009 }
0x1561   :  { %v400_v57 = vmul.f32 0.6931472, %v1010_v53 }
0x1563   :  { %v401_v62 = vadd.f32 %v400_v57, %v1200_v5 }
0x1565   :  { %v410_v8 = vsub.f32 %v401_v62, %v409_v59 }
0x1568   :  { %514 = vadd.xlane.f32.xlu2 %v513_v47 }
0x1570   :  { %832 = vadd.xlane.f32.xlu2 %v831_v49 }
0x1595   :  { %v503_v50 = vpop.xlane.xlu2 %502 }
0x1596   :  { %1011 = vlog2.f32 %v503_v50 }
0x1597   :  { %1013 = vlog2.f32 %v609_v51 }
0x1598   :  { %1015 = vlog2.f32 %v715_v52 }
0x159c   :  { %v1012_v54 = vpop.eup %1011 }
0x159d   :  { %v1014_v56 = vpop.eup %1013  ;;  %v505_v58 = vmul.f32 0.6931472, %v1012_v54 }
0x159e   :  { %v611_v60 = vmul.f32 0.6931472, %v1014_v56  ;;  %v1016_v61 = vpop.eup %1015 }
0x159f   :  { %v506_v63 = vadd.f32 %v505_v58, %v498_v2  ;;  %v717_v4 = vmul.f32 0.6931472, %v1016_v61 }
0x15a0   :  { %v612_v6 = vadd.f32 %v611_v60, %v1209_v15  ;;  %v1039_v15 = vmov 4.0  }
0x15a1   :  { %v718_v14 = vadd.f32 %v717_v4, %v1216_v24 }
0x15a2   :  { %v622_v10 = vsub.f32 %v612_v6, %v621_v1 }
0x15d2   :  { %v727_v13 = vpop.xlane.xlu1 %726 }
0x15d3   :  { %v821_v55 = vpop.xlane.xlu2 %820  ;;  %v728_v17 = vsub.f32 %v718_v14, %v727_v13 }
0x15d4   :  { %1017 = vlog2.f32 %v821_v55 }
0x15d5   :  { %1019 = vrcp.f32 %v1039_v15 }
0x15da   :  { %v1018_v0 = vpop.eup %1017 }
0x15db   :  { %v515_v3 = vpop.xlane.xlu2 %514  ;;  %v823_v11 = vmul.f32 0.6931472, %v1018_v0  ;;  %v1020_v25 = vpop.eup %1019 }
0x15dc   :  { %v516_v9 = vsub.f32 %v506_v63, %v515_v3  ;;  %v854_v26 = vmul.f32 4.0, %v1020_v25  ;;  %vm858_vm13 = vweird.f32 %v1020_v25 }
0x15dd   :  { %v824_v18 = vadd.f32 %v823_v11, %v816_v40 }
0x15de   :  { %v517_v12 = vadd.f32 %v516_v9, %v410_v8  ;;  %v855_v27 = vsub.f32 1.0, %v854_v26 }
0x15e0   :  { %v623_v16 = vadd.f32 %v622_v10, %v517_v12  ;;  %v856_v30 = vmul.f32 %v1020_v25, %v855_v27 }
0x15e2   :  { %v729_v5 = vadd.f32 %v728_v17, %v623_v16  ;;  %v857_v33 = vadd.f32 %v1020_v25, %v856_v30 }
0x15e3   :  { %v833_v19 = vpop.xlane.xlu2 %832 }
0x15e4   :  { %v834_v20 = vsub.f32 %v824_v18, %v833_v19  ;;  %v859_v36 = vsel %vm858_vm13, %v1020_v25, %v857_v33 }
0x15e6   :  { %v835_v21 = vadd.f32 %v834_v20, %v729_v5 }
0x15e8   :  { %v841_v22 = vmul.f32 %v1094_v7, %v835_v21 }
0x15ea   :  { %v843_v23 = vsel %vm842_vm12, %v841_v22, 0.0 }
0x15eb   :  { %844 = vadd.xlane.f32.xlu0 %v843_v23 }
0x165e   :  { %v845_v28 = vpop.xlane.xlu0 %844 }
0x165f   :  { %v846_v29 = vrot.slane %v845_v28, 4 }
0x1661   :  { %v847_v24 = vadd.f32 %v846_v29, %v845_v28 }
0x1663   :  { %v848_v31 = vrot.slane %v847_v24, 2 }
0x1665   :  { %v849_v32 = vadd.f32 %v848_v31, %v847_v24 }
0x1667   :  { %v850_v34 = vrot.slane %v849_v32, 1 }
0x1669   :  { %v851_v35 = vadd.f32 %v850_v34, %v849_v32 }
0x166b   :  { %913 = vpush %v851_v35 }
0x166c   :  { %915 = vpush %v859_v36 }
0x169c   :  { %s914_s27 = spop %913 }
0x169d   :  { %s916_s28 = spop %915 }
0x169e   :  { %s861_s29 = smul.f32 %s916_s28, %s914_s27 }
0x16a0   :  { %863 = sst [smem:[#allocation2]] %s861_s29 }
0x16a1   :  { %872 = dma.smem_to_hbm %s1040_s30, 16, %s870_s26, [#allocation3]  }
0x16a2   :  { %1033 = dma.done.wait [#allocation3], 16  }
0x16a3   :  { %1034 = vsyncadd [#allocation3], 4294967280 }
0x16a4   :  { %877 = sfence }
0x16a5   :  { %878 = vsyncpa [#allocation3], 1 }

</bundles_post_ra>
